<compile_context>
chip_gen: v7x
topology: tpu7x:2x2x1
jax: 0.10.0
libtpu: 0.0.40
codegen_flags: <defaults>
</compile_context>

<pallas_src>
import functools

import jax
import jax.numpy as jnp
from jax import lax
from jax.experimental import pallas as pl
from jax.experimental.pallas import tpu as pltpu


# ---------------------------------------------------------------------------
# Model hyper-parameters (mirror USAD.__init__ with feats=4)
# ---------------------------------------------------------------------------
N_FEATS = 4
N_WINDOW = 5
N_HIDDEN = 16
N_LATENT = 5
N = N_FEATS * N_WINDOW          # 20 (flattened window)
PAD = 24                        # every feature dim zero-padded to 24 (multiple of 8 sublanes)
NUM_LAYERS = 9

# (name, in_dim, out_dim) in forward order: encoder (0-2), decoder1 (3-5), decoder2 (6-8).
LAYERS = (
    ("e1", N, N_HIDDEN), ("e2", N_HIDDEN, N_HIDDEN), ("e3", N_HIDDEN, N_LATENT),
    ("d11", N_LATENT, N_HIDDEN), ("d12", N_HIDDEN, N_HIDDEN), ("d13", N_HIDDEN, N),
    ("d21", N_LATENT, N_HIDDEN), ("d22", N_HIDDEN, N_HIDDEN), ("d23", N_HIDDEN, N),
)


# ---------------------------------------------------------------------------
# Pallas kernel: full USAD forward on one batch tile
#   x_ref : (tb, N)            batch-major raw window, streamed over the batch
#   w_ref : (9*PAD, PAD)       packed, zero-padded weights (resident in VMEM)
#   b_ref : (9*PAD, 1)         packed, zero-padded biases  (resident in VMEM)
#   o*_ref: (tb, N)            batch-major outputs (ae1, ae2, ae2ae1)
# Inside the kernel all activations are lane-dense (feature, batch): (PAD, tb).
# ---------------------------------------------------------------------------
def usad_kernel(x_ref, w_ref, b_ref, o1_ref, o2_ref, o3_ref):
    x = x_ref[...]                                   # (tb, N) batch-major
    tb = x.shape[0]

    def w_block(k):
        # Static, sublane-aligned slice of the packed weight slab (free).
        return w_ref[k * PAD:(k + 1) * PAD, :]       # (PAD, PAD), W_k top-left, zeros elsewhere

    def b_block(k):
        return b_ref[k * PAD:(k + 1) * PAD, :]       # (PAD, 1): broadcasts over batch lanes

    def layer_fm(h, k):
        # Feature-major layer: h (PAD, L) -> (PAD, L).  Zero-padded weight columns make
        # the padded rows of h harmless.
        return jnp.dot(w_block(k), h, preferred_element_type=jnp.float32) + b_block(k)

    def relu(v):
        return jnp.maximum(v, 0.0)

    def sigmoid(v):
        # Exact, stable sigmoid; tanh issues on the EUP slot (no VALU divide,
        # no approximate reciprocal).
        return 0.5 * (jnp.tanh(0.5 * v) + 1.0)

    # --- encoder on the raw batch-major input -------------------------------
    # First layer fuses the layout transpose: h0 = W0 @ x^T via a transposed-RHS
    # contraction (contract W0's in-dim with x's feature lanes).
    w0 = w_ref[0:PAD, 0:N]                           # (PAD, N)
    h = lax.dot_general(w0, x, (((1,), (1,)), ((), ())),
                        preferred_element_type=jnp.float32) + b_block(0)   # (PAD, tb)
    h = relu(h)
    h = relu(layer_fm(h, 1))
    z = relu(layer_fm(h, 2))                         # (PAD, tb), rows >= N_LATENT are 0

    # --- decoder1 ------------------------------------------------------------
    ae1 = sigmoid(layer_fm(relu(layer_fm(relu(layer_fm(z, 3)), 4)), 5))    # (PAD, tb)

    # --- encoder on ae1 (already feature-major; padded cols of W0 kill the
    #     sigmoid(0)=0.5 padded rows of ae1) ---------------------------------
    h = relu(layer_fm(ae1, 0))
    h = relu(layer_fm(h, 1))
    z1 = relu(layer_fm(h, 2))                        # (PAD, tb)

    # --- decoder2, shared by ae2 and ae2ae1: run ONCE on a 2x-wide RHS -------
    zz = jnp.concatenate([z, z1], axis=1)            # (PAD, 2*tb)
    y = sigmoid(layer_fm(relu(layer_fm(relu(layer_fm(zz, 6)), 7)), 8))     # (PAD, 2*tb)
    ae2 = y[:, :tb]
    ae2ae1 = y[:, tb:]

    # --- batch-major writeback: one XLU transpose per output, keep the N valid
    #     feature lanes, full-block stores (edge blocks are masked by Pallas) --
    o1_ref[...] = ae1.T[:, :N]
    o2_ref[...] = ae2.T[:, :N]
    o3_ref[...] = ae2ae1.T[:, :N]


# ---------------------------------------------------------------------------
# Parameter packing: 18 tiny arrays -> 2 zero-padded slabs (one DMA each).
# Call this ONCE outside the hot path and pass the slabs to usad_forward.
# ---------------------------------------------------------------------------
def pack_params(params):
    w_slab = jnp.zeros((NUM_LAYERS * PAD, PAD), jnp.float32)
    b_slab = jnp.zeros((NUM_LAYERS * PAD, 1), jnp.float32)
    for k, (name, din, dout) in enumerate(LAYERS):
        w = params[name + "_w"]   # (dout, din) -- PyTorch nn.Linear layout
        b = params[name + "_b"]   # (dout,)
        w_slab = w_slab.at[k * PAD:k * PAD + dout, :din].set(w)
        b_slab = b_slab.at[k * PAD:k * PAD + dout, 0].set(b)
    return w_slab, b_slab


# ---------------------------------------------------------------------------
# Wrapper
# ---------------------------------------------------------------------------
def _round_up(x, m):
    return ((x + m - 1) // m) * m


@functools.partial(jax.jit, static_argnames=("tile_b",))
def usad_forward(g, w_slab, b_slab, *, tile_b=4096):
    """g: (B, n_window, n_feats) float32. Returns (ae1, ae2, ae2ae1), each same shape."""
    B = g.shape[0]
    assert g.shape[1:] == (N_WINDOW, N_FEATS)

    # Free view: Flatten. No transpose, no padding pass in the wrapper.
    x2d = g.reshape(B, N)

    # Batch tile: big (amortize the ~0.35 us/grid-step overhead), but capped so the
    # grid has >= 2 steps whenever the batch allows it (v7x megacore uses both TCs).
    b_ceil = _round_up(max(B, 1), 128)
    tb = max(128, min(_round_up(tile_b, 128), _round_up((b_ceil + 1) // 2, 128)))
    grid = pl.cdiv(B, tb)

    out_sds = jax.ShapeDtypeStruct((B, N), jnp.float32)
    io_spec = pl.BlockSpec((tb, N), lambda i: (i, 0))

    ae1, ae2, ae2ae1 = pl.pallas_call(
        usad_kernel,
        out_shape=(out_sds, out_sds, out_sds),
        grid_spec=pltpu.PrefetchScalarGridSpec(
            num_scalar_prefetch=0,
            grid=(grid,),
            in_specs=[
                io_spec,                                                   # x: streamed over batch
                pl.BlockSpec((NUM_LAYERS * PAD, PAD), lambda i: (0, 0)),   # weights: fetched once
                pl.BlockSpec((NUM_LAYERS * PAD, 1), lambda i: (0, 0)),     # biases: fetched once
            ],
            out_specs=[io_spec, io_spec, io_spec],                         # batch-major outputs
        ),
        compiler_params=pltpu.CompilerParams(
            # Independent batch tiles: shard the grid across TensorCores (megacore / v7x).
            dimension_semantics=("parallel",),
        ),
    )(x2d, w_slab, b_slab)

    shape3 = (B, N_WINDOW, N_FEATS)
    # Pure (free) reshapes -- no wrapper transpose or slice passes.
    return ae1.reshape(shape3), ae2.reshape(shape3), ae2ae1.reshape(shape3)


# ---------------------------------------------------------------------------
# Deterministic parameter initialization (PyTorch-Linear-style uniform, synthetic)
# ---------------------------------------------------------------------------
def init_params(key):
    params = {}
    keys = jax.random.split(key, len(LAYERS))
    for k, (name, din, dout) in enumerate(LAYERS):
        kw, kb = jax.random.split(keys[k])
        bound = 1.0 / jnp.sqrt(float(din))
        params[name + "_w"] = jax.random.uniform(kw, (dout, din), jnp.float32, -bound, bound)
        params[name + "_b"] = jax.random.uniform(kb, (dout,), jnp.float32, -bound, bound)
    return params


# ---------------------------------------------------------------------------
# Pure-JAX reference (sanity check against the kernel)
# ---------------------------------------------------------------------------
def usad_forward_ref(g, p):
    x = g.reshape(g.shape[0], N)

    def lin(h, name):
        return h @ p[name + "_w"].T + p[name + "_b"]

    def enc(h):
        h = jnp.maximum(lin(h, "e1"), 0.0)
        h = jnp.maximum(lin(h, "e2"), 0.0)
        h = jnp.maximum(lin(h, "e3"), 0.0)
        return h

    def dec(h, pre):
        h = jnp.maximum(lin(h, pre + "1"), 0.0)
        h = jnp.maximum(lin(h, pre + "2"), 0.0)
        h = jax.nn.sigmoid(lin(h, pre + "3"))
        return h

    z = enc(x)
    ae1 = dec(z, "d1")
    ae2 = dec(z, "d2")
    ae2ae1 = dec(enc(ae1), "d2")
    s = (-1, N_WINDOW, N_FEATS)
    return ae1.reshape(s), ae2.reshape(s), ae2ae1.reshape(s)


if __name__ == "__main__":
    key = jax.random.PRNGKey(0)
    k_params, k_data = jax.random.split(key)

    params = init_params(k_params)
    # Packed once, outside the jitted forward (per the performance review).
    w_slab, b_slab = pack_params(params)

    # Small demo batch; deliberately NOT a multiple of 128 to exercise the masked
    # edge-block path, and small enough that the tile cap yields a 2-step grid.
    B = 300
    g = jax.random.uniform(k_data, (B, N_WINDOW, N_FEATS), jnp.float32)

    ae1, ae2, ae2ae1 = usad_forward(g, w_slab, b_slab)
    jax.block_until_ready((ae1, ae2, ae2ae1))

    # Sanity check against the pure-JAX reference (exact sigmoid now -> tight tolerance;
    # residual diffs come only from EUP transcendental rounding and padded-contraction
    # summation order).
    r1, r2, r3 = usad_forward_ref(g, params)
    assert ae1.shape == (B, N_WINDOW, N_FEATS)
    assert ae2.shape == (B, N_WINDOW, N_FEATS)
    assert ae2ae1.shape == (B, N_WINDOW, N_FEATS)
    tol = 1e-4
    assert jnp.allclose(ae1, r1, atol=tol), float(jnp.max(jnp.abs(ae1 - r1)))
    assert jnp.allclose(ae2, r2, atol=tol), float(jnp.max(jnp.abs(ae2 - r2)))
    assert jnp.allclose(ae2ae1, r3, atol=tol), float(jnp.max(jnp.abs(ae2ae1 - r3)))

    print("KERNEL_OK")
</pallas_src>

<mosaic_0001>
module attributes {stable_mosaic.version = 11 : i64} {
  func.func @usad_kernel(%arg0: i32, %arg1: memref<256x20xf32, #tpu.memory_space<vmem>>, %arg2: memref<216x24xf32, #tpu.memory_space<vmem>>, %arg3: memref<216x1xf32, #tpu.memory_space<vmem>>, %arg4: memref<256x20xf32, #tpu.memory_space<vmem>>, %arg5: memref<256x20xf32, #tpu.memory_space<vmem>>, %arg6: memref<256x20xf32, #tpu.memory_space<vmem>>) attributes {dimension_semantics = [#tpu.dimension_semantics<parallel>], iteration_bounds = array<i64: 2>, scalar_prefetch = 0 : i64, scratch_operands = 0 : i64, tpu.core_type = #tpu.core_type<tc>, window_params = [{transform_indices = @transform_0, window_bounds = array<i64: 256, 20>}, {pipeline_mode = #tpu.pipeline_mode<synchronous>, transform_indices = @transform_1, window_bounds = array<i64: 216, 24>}, {pipeline_mode = #tpu.pipeline_mode<synchronous>, transform_indices = @transform_2, window_bounds = array<i64: 216, 1>}, {transform_indices = @transform_3, window_bounds = array<i64: 256, 20>}, {transform_indices = @transform_4, window_bounds = array<i64: 256, 20>}, {transform_indices = @transform_5, window_bounds = array<i64: 256, 20>}]} {
    %c0 = arith.constant 0 : index
    %c0_0 = arith.constant 0 : index
    %0 = vector.load %arg1[%c0, %c0_0] : memref<256x20xf32, #tpu.memory_space<vmem>>, vector<256x20xf32>
    %c0_1 = arith.constant 0 : index
    %c0_2 = arith.constant 0 : index
    %1 = vector.load %arg2[%c0_1, %c0_2] : memref<216x24xf32, #tpu.memory_space<vmem>>, vector<24x20xf32>
    %cst = arith.constant dense<0.000000e+00> : vector<24x256xf32>
    %2 = tpu.matmul %1, %0, %cst {dimension_numbers = #tpu.dot_dimension_numbers<[1], [1], [0], [0], [0, 0, 1, 0], [], []>} : vector<24x20xf32>, vector<256x20xf32>, vector<24x256xf32> -> vector<24x256xf32>
    %c0_3 = arith.constant 0 : index
    %c0_4 = arith.constant 0 : index
    %3 = vector.load %arg3[%c0_3, %c0_4] : memref<216x1xf32, #tpu.memory_space<vmem>>, vector<24x1xf32>
    %4 = vector.broadcast %3 : vector<24x1xf32> to vector<24x256xf32>
    %5 = arith.addf %2, %4 : vector<24x256xf32>
    %cst_5 = arith.constant 0.000000e+00 : f32
    %6 = vector.broadcast %cst_5 : f32 to vector<24x256xf32>
    %7 = arith.maximumf %5, %6 : vector<24x256xf32>
    %c24 = arith.constant 24 : index
    %c0_6 = arith.constant 0 : index
    %8 = vector.load %arg2[%c24, %c0_6] : memref<216x24xf32, #tpu.memory_space<vmem>>, vector<24x24xf32>
    %cst_7 = arith.constant dense<0.000000e+00> : vector<24x256xf32>
    %9 = tpu.matmul %8, %7, %cst_7 {dimension_numbers = #tpu.dot_dimension_numbers<[1], [0], [0], [1], [0, 0, 1, 1], [], []>} : vector<24x24xf32>, vector<24x256xf32>, vector<24x256xf32> -> vector<24x256xf32>
    %c24_8 = arith.constant 24 : index
    %c0_9 = arith.constant 0 : index
    %10 = vector.load %arg3[%c24_8, %c0_9] : memref<216x1xf32, #tpu.memory_space<vmem>>, vector<24x1xf32>
    %11 = vector.broadcast %10 : vector<24x1xf32> to vector<24x256xf32>
    %12 = arith.addf %9, %11 : vector<24x256xf32>
    %cst_10 = arith.constant 0.000000e+00 : f32
    %13 = vector.broadcast %cst_10 : f32 to vector<24x256xf32>
    %14 = arith.maximumf %12, %13 : vector<24x256xf32>
    %c48 = arith.constant 48 : index
    %c0_11 = arith.constant 0 : index
    %15 = vector.load %arg2[%c48, %c0_11] : memref<216x24xf32, #tpu.memory_space<vmem>>, vector<24x24xf32>
    %cst_12 = arith.constant dense<0.000000e+00> : vector<24x256xf32>
    %16 = tpu.matmul %15, %14, %cst_12 {dimension_numbers = #tpu.dot_dimension_numbers<[1], [0], [0], [1], [0, 0, 1, 1], [], []>} : vector<24x24xf32>, vector<24x256xf32>, vector<24x256xf32> -> vector<24x256xf32>
    %c48_13 = arith.constant 48 : index
    %c0_14 = arith.constant 0 : index
    %17 = vector.load %arg3[%c48_13, %c0_14] : memref<216x1xf32, #tpu.memory_space<vmem>>, vector<24x1xf32>
    %18 = vector.broadcast %17 : vector<24x1xf32> to vector<24x256xf32>
    %19 = arith.addf %16, %18 : vector<24x256xf32>
    %cst_15 = arith.constant 0.000000e+00 : f32
    %20 = vector.broadcast %cst_15 : f32 to vector<24x256xf32>
    %21 = arith.maximumf %19, %20 : vector<24x256xf32>
    %c72 = arith.constant 72 : index
    %c0_16 = arith.constant 0 : index
    %22 = vector.load %arg2[%c72, %c0_16] : memref<216x24xf32, #tpu.memory_space<vmem>>, vector<24x24xf32>
    %cst_17 = arith.constant dense<0.000000e+00> : vector<24x256xf32>
    %23 = tpu.matmul %22, %21, %cst_17 {dimension_numbers = #tpu.dot_dimension_numbers<[1], [0], [0], [1], [0, 0, 1, 1], [], []>} : vector<24x24xf32>, vector<24x256xf32>, vector<24x256xf32> -> vector<24x256xf32>
    %c72_18 = arith.constant 72 : index
    %c0_19 = arith.constant 0 : index
    %24 = vector.load %arg3[%c72_18, %c0_19] : memref<216x1xf32, #tpu.memory_space<vmem>>, vector<24x1xf32>
    %25 = vector.broadcast %24 : vector<24x1xf32> to vector<24x256xf32>
    %26 = arith.addf %23, %25 : vector<24x256xf32>
    %cst_20 = arith.constant 0.000000e+00 : f32
    %27 = vector.broadcast %cst_20 : f32 to vector<24x256xf32>
    %28 = arith.maximumf %26, %27 : vector<24x256xf32>
    %c96 = arith.constant 96 : index
    %c0_21 = arith.constant 0 : index
    %29 = vector.load %arg2[%c96, %c0_21] : memref<216x24xf32, #tpu.memory_space<vmem>>, vector<24x24xf32>
    %cst_22 = arith.constant dense<0.000000e+00> : vector<24x256xf32>
    %30 = tpu.matmul %29, %28, %cst_22 {dimension_numbers = #tpu.dot_dimension_numbers<[1], [0], [0], [1], [0, 0, 1, 1], [], []>} : vector<24x24xf32>, vector<24x256xf32>, vector<24x256xf32> -> vector<24x256xf32>
    %c96_23 = arith.constant 96 : index
    %c0_24 = arith.constant 0 : index
    %31 = vector.load %arg3[%c96_23, %c0_24] : memref<216x1xf32, #tpu.memory_space<vmem>>, vector<24x1xf32>
    %32 = vector.broadcast %31 : vector<24x1xf32> to vector<24x256xf32>
    %33 = arith.addf %30, %32 : vector<24x256xf32>
    %cst_25 = arith.constant 0.000000e+00 : f32
    %34 = vector.broadcast %cst_25 : f32 to vector<24x256xf32>
    %35 = arith.maximumf %33, %34 : vector<24x256xf32>
    %c120 = arith.constant 120 : index
    %c0_26 = arith.constant 0 : index
    %36 = vector.load %arg2[%c120, %c0_26] : memref<216x24xf32, #tpu.memory_space<vmem>>, vector<24x24xf32>
    %cst_27 = arith.constant dense<0.000000e+00> : vector<24x256xf32>
    %37 = tpu.matmul %36, %35, %cst_27 {dimension_numbers = #tpu.dot_dimension_numbers<[1], [0], [0], [1], [0, 0, 1, 1], [], []>} : vector<24x24xf32>, vector<24x256xf32>, vector<24x256xf32> -> vector<24x256xf32>
    %c120_28 = arith.constant 120 : index
    %c0_29 = arith.constant 0 : index
    %38 = vector.load %arg3[%c120_28, %c0_29] : memref<216x1xf32, #tpu.memory_space<vmem>>, vector<24x1xf32>
    %39 = vector.broadcast %38 : vector<24x1xf32> to vector<24x256xf32>
    %40 = arith.addf %37, %39 : vector<24x256xf32>
    %cst_30 = arith.constant 5.000000e-01 : f32
    %41 = vector.broadcast %cst_30 : f32 to vector<24x256xf32>
    %42 = arith.mulf %41, %40 : vector<24x256xf32>
    %43 = math.tanh %42 : vector<24x256xf32>
    %cst_31 = arith.constant 1.000000e+00 : f32
    %44 = vector.broadcast %cst_31 : f32 to vector<24x256xf32>
    %45 = arith.addf %43, %44 : vector<24x256xf32>
    %cst_32 = arith.constant 5.000000e-01 : f32
    %46 = vector.broadcast %cst_32 : f32 to vector<24x256xf32>
    %47 = arith.mulf %46, %45 : vector<24x256xf32>
    %c0_33 = arith.constant 0 : index
    %c0_34 = arith.constant 0 : index
    %48 = vector.load %arg2[%c0_33, %c0_34] : memref<216x24xf32, #tpu.memory_space<vmem>>, vector<24x24xf32>
    %cst_35 = arith.constant dense<0.000000e+00> : vector<24x256xf32>
    %49 = tpu.matmul %48, %47, %cst_35 {dimension_numbers = #tpu.dot_dimension_numbers<[1], [0], [0], [1], [0, 0, 1, 1], [], []>} : vector<24x24xf32>, vector<24x256xf32>, vector<24x256xf32> -> vector<24x256xf32>
    %c0_36 = arith.constant 0 : index
    %c0_37 = arith.constant 0 : index
    %50 = vector.load %arg3[%c0_36, %c0_37] : memref<216x1xf32, #tpu.memory_space<vmem>>, vector<24x1xf32>
    %51 = vector.broadcast %50 : vector<24x1xf32> to vector<24x256xf32>
    %52 = arith.addf %49, %51 : vector<24x256xf32>
    %cst_38 = arith.constant 0.000000e+00 : f32
    %53 = vector.broadcast %cst_38 : f32 to vector<24x256xf32>
    %54 = arith.maximumf %52, %53 : vector<24x256xf32>
    %c24_39 = arith.constant 24 : index
    %c0_40 = arith.constant 0 : index
    %55 = vector.load %arg2[%c24_39, %c0_40] : memref<216x24xf32, #tpu.memory_space<vmem>>, vector<24x24xf32>
    %cst_41 = arith.constant dense<0.000000e+00> : vector<24x256xf32>
    %56 = tpu.matmul %55, %54, %cst_41 {dimension_numbers = #tpu.dot_dimension_numbers<[1], [0], [0], [1], [0, 0, 1, 1], [], []>} : vector<24x24xf32>, vector<24x256xf32>, vector<24x256xf32> -> vector<24x256xf32>
    %c24_42 = arith.constant 24 : index
    %c0_43 = arith.constant 0 : index
    %57 = vector.load %arg3[%c24_42, %c0_43] : memref<216x1xf32, #tpu.memory_space<vmem>>, vector<24x1xf32>
    %58 = vector.broadcast %57 : vector<24x1xf32> to vector<24x256xf32>
    %59 = arith.addf %56, %58 : vector<24x256xf32>
    %cst_44 = arith.constant 0.000000e+00 : f32
    %60 = vector.broadcast %cst_44 : f32 to vector<24x256xf32>
    %61 = arith.maximumf %59, %60 : vector<24x256xf32>
    %c48_45 = arith.constant 48 : index
    %c0_46 = arith.constant 0 : index
    %62 = vector.load %arg2[%c48_45, %c0_46] : memref<216x24xf32, #tpu.memory_space<vmem>>, vector<24x24xf32>
    %cst_47 = arith.constant dense<0.000000e+00> : vector<24x256xf32>
    %63 = tpu.matmul %62, %61, %cst_47 {dimension_numbers = #tpu.dot_dimension_numbers<[1], [0], [0], [1], [0, 0, 1, 1], [], []>} : vector<24x24xf32>, vector<24x256xf32>, vector<24x256xf32> -> vector<24x256xf32>
    %c48_48 = arith.constant 48 : index
    %c0_49 = arith.constant 0 : index
    %64 = vector.load %arg3[%c48_48, %c0_49] : memref<216x1xf32, #tpu.memory_space<vmem>>, vector<24x1xf32>
    %65 = vector.broadcast %64 : vector<24x1xf32> to vector<24x256xf32>
    %66 = arith.addf %63, %65 : vector<24x256xf32>
    %cst_50 = arith.constant 0.000000e+00 : f32
    %67 = vector.broadcast %cst_50 : f32 to vector<24x256xf32>
    %68 = arith.maximumf %66, %67 : vector<24x256xf32>
    %69 = tpu.concatenate %21, %68 in 1 : vector<24x256xf32>, vector<24x256xf32> -> vector<24x512xf32>
    %c144 = arith.constant 144 : index
    %c0_51 = arith.constant 0 : index
    %70 = vector.load %arg2[%c144, %c0_51] : memref<216x24xf32, #tpu.memory_space<vmem>>, vector<24x24xf32>
    %cst_52 = arith.constant dense<0.000000e+00> : vector<24x512xf32>
    %71 = tpu.matmul %70, %69, %cst_52 {dimension_numbers = #tpu.dot_dimension_numbers<[1], [0], [0], [1], [0, 0, 1, 1], [], []>} : vector<24x24xf32>, vector<24x512xf32>, vector<24x512xf32> -> vector<24x512xf32>
    %c144_53 = arith.constant 144 : index
    %c0_54 = arith.constant 0 : index
    %72 = vector.load %arg3[%c144_53, %c0_54] : memref<216x1xf32, #tpu.memory_space<vmem>>, vector<24x1xf32>
    %73 = vector.broadcast %72 : vector<24x1xf32> to vector<24x512xf32>
    %74 = arith.addf %71, %73 : vector<24x512xf32>
    %cst_55 = arith.constant 0.000000e+00 : f32
    %75 = vector.broadcast %cst_55 : f32 to vector<24x512xf32>
    %76 = arith.maximumf %74, %75 : vector<24x512xf32>
    %c168 = arith.constant 168 : index
    %c0_56 = arith.constant 0 : index
    %77 = vector.load %arg2[%c168, %c0_56] : memref<216x24xf32, #tpu.memory_space<vmem>>, vector<24x24xf32>
    %cst_57 = arith.constant dense<0.000000e+00> : vector<24x512xf32>
    %78 = tpu.matmul %77, %76, %cst_57 {dimension_numbers = #tpu.dot_dimension_numbers<[1], [0], [0], [1], [0, 0, 1, 1], [], []>} : vector<24x24xf32>, vector<24x512xf32>, vector<24x512xf32> -> vector<24x512xf32>
    %c168_58 = arith.constant 168 : index
    %c0_59 = arith.constant 0 : index
    %79 = vector.load %arg3[%c168_58, %c0_59] : memref<216x1xf32, #tpu.memory_space<vmem>>, vector<24x1xf32>
    %80 = vector.broadcast %79 : vector<24x1xf32> to vector<24x512xf32>
    %81 = arith.addf %78, %80 : vector<24x512xf32>
    %cst_60 = arith.constant 0.000000e+00 : f32
    %82 = vector.broadcast %cst_60 : f32 to vector<24x512xf32>
    %83 = arith.maximumf %81, %82 : vector<24x512xf32>
    %c192 = arith.constant 192 : index
    %c0_61 = arith.constant 0 : index
    %84 = vector.load %arg2[%c192, %c0_61] : memref<216x24xf32, #tpu.memory_space<vmem>>, vector<24x24xf32>
    %cst_62 = arith.constant dense<0.000000e+00> : vector<24x512xf32>
    %85 = tpu.matmul %84, %83, %cst_62 {dimension_numbers = #tpu.dot_dimension_numbers<[1], [0], [0], [1], [0, 0, 1, 1], [], []>} : vector<24x24xf32>, vector<24x512xf32>, vector<24x512xf32> -> vector<24x512xf32>
    %c192_63 = arith.constant 192 : index
    %c0_64 = arith.constant 0 : index
    %86 = vector.load %arg3[%c192_63, %c0_64] : memref<216x1xf32, #tpu.memory_space<vmem>>, vector<24x1xf32>
    %87 = vector.broadcast %86 : vector<24x1xf32> to vector<24x512xf32>
    %88 = arith.addf %85, %87 : vector<24x512xf32>
    %cst_65 = arith.constant 5.000000e-01 : f32
    %89 = vector.broadcast %cst_65 : f32 to vector<24x512xf32>
    %90 = arith.mulf %89, %88 : vector<24x512xf32>
    %91 = math.tanh %90 : vector<24x512xf32>
    %cst_66 = arith.constant 1.000000e+00 : f32
    %92 = vector.broadcast %cst_66 : f32 to vector<24x512xf32>
    %93 = arith.addf %91, %92 : vector<24x512xf32>
    %cst_67 = arith.constant 5.000000e-01 : f32
    %94 = vector.broadcast %cst_67 : f32 to vector<24x512xf32>
    %95 = arith.mulf %94, %93 : vector<24x512xf32>
    %96 = vector.extract_strided_slice %95 {offsets = [0, 0], sizes = [24, 256], strides = [1, 1]} : vector<24x512xf32> to vector<24x256xf32>
    %97 = vector.extract_strided_slice %95 {offsets = [0, 256], sizes = [24, 256], strides = [1, 1]} : vector<24x512xf32> to vector<24x256xf32>
    %98 = tpu.transpose %47, [1, 0] : vector<24x256xf32> -> vector<256x24xf32>
    %99 = vector.extract_strided_slice %98 {offsets = [0, 0], sizes = [256, 20], strides = [1, 1]} : vector<256x24xf32> to vector<256x20xf32>
    %c0_68 = arith.constant 0 : index
    %c0_69 = arith.constant 0 : index
    %100 = vector.load %arg4[%c0_68, %c0_69] : memref<256x20xf32, #tpu.memory_space<vmem>>, vector<256x20xf32>
    tpu.vector_store %arg4[%c0_68, %c0_69], %99 {strides = array<i32>} : memref<256x20xf32, #tpu.memory_space<vmem>>, vector<256x20xf32>,
    %101 = tpu.transpose %96, [1, 0] : vector<24x256xf32> -> vector<256x24xf32>
    %102 = vector.extract_strided_slice %101 {offsets = [0, 0], sizes = [256, 20], strides = [1, 1]} : vector<256x24xf32> to vector<256x20xf32>
    %c0_70 = arith.constant 0 : index
    %c0_71 = arith.constant 0 : index
    %103 = vector.load %arg5[%c0_70, %c0_71] : memref<256x20xf32, #tpu.memory_space<vmem>>, vector<256x20xf32>
    tpu.vector_store %arg5[%c0_70, %c0_71], %102 {strides = array<i32>} : memref<256x20xf32, #tpu.memory_space<vmem>>, vector<256x20xf32>,
    %104 = tpu.transpose %97, [1, 0] : vector<24x256xf32> -> vector<256x24xf32>
    %105 = vector.extract_strided_slice %104 {offsets = [0, 0], sizes = [256, 20], strides = [1, 1]} : vector<256x24xf32> to vector<256x20xf32>
    %c0_72 = arith.constant 0 : index
    %c0_73 = arith.constant 0 : index
    %106 = vector.load %arg6[%c0_72, %c0_73] : memref<256x20xf32, #tpu.memory_space<vmem>>, vector<256x20xf32>
    tpu.vector_store %arg6[%c0_72, %c0_73], %105 {strides = array<i32>} : memref<256x20xf32, #tpu.memory_space<vmem>>, vector<256x20xf32>,
    return
  }
  func.func @transform_0(%arg0: i32) -> (i32, i32) {
    %c0_i32 = arith.constant 0 : i32
    %c0_i32_0 = arith.constant 0 : i32
    return %arg0, %c0_i32 : i32, i32
  }
  func.func @transform_1(%arg0: i32) -> (i32, i32) {
    %c0_i32 = arith.constant 0 : i32
    %c0_i32_0 = arith.constant 0 : i32
    %c0_i32_1 = arith.constant 0 : i32
    return %c0_i32, %c0_i32_0 : i32, i32
  }
  func.func @transform_2(%arg0: i32) -> (i32, i32) {
    %c0_i32 = arith.constant 0 : i32
    %c0_i32_0 = arith.constant 0 : i32
    %c0_i32_1 = arith.constant 0 : i32
    return %c0_i32, %c0_i32_0 : i32, i32
  }
  func.func @transform_3(%arg0: i32) -> (i32, i32) {
    %c0_i32 = arith.constant 0 : i32
    %c0_i32_0 = arith.constant 0 : i32
    return %arg0, %c0_i32 : i32, i32
  }
  func.func @transform_4(%arg0: i32) -> (i32, i32) {
    %c0_i32 = arith.constant 0 : i32
    %c0_i32_0 = arith.constant 0 : i32
    return %arg0, %c0_i32 : i32, i32
  }
  func.func @transform_5(%arg0: i32) -> (i32, i32) {
    %c0_i32 = arith.constant 0 : i32
    %c0_i32_0 = arith.constant 0 : i32
    return %arg0, %c0_i32 : i32, i32
  }
}

</mosaic_0001>

<bundles_post_ra>
// kernel: usad_forward.1
= control target key start
LH: loop header
LB: loop body
LE: loop exit
PB: predicated region body
PF: predicated region fallthrough
CT: control target
= control target key end

     0   :  { %s4111_s18 = smov 0   ;;  %s4113_s19 = smov 0   ;;  %s5278_s0 = inlined_call_operand.vmem [shape: f32[300,20], index: 0, kind: input, shape index: {}]   ;;  %s5279_s1 = inlined_call_operand.vmem [shape: f32[216,24], index: 1, kind: input, shape index: {}]   ;;  %s5280_s2 = inlined_call_operand.vmem [shape: f32[216,1], index: 2, kind: input, shape index: {}]   ;;  %s5281_s3 = inlined_call_operand.vmem [shape: f32[300,20], index: 3, kind: output, shape index: {0}]   ;;  %s5282_s4 = inlined_call_operand.vmem [shape: f32[300,20], index: 4, kind: output, shape index: {1}]   ;;  %s5283_s5 = inlined_call_operand.vmem [shape: f32[300,20], index: 5, kind: output, shape index: {2}]  }
   0x1   :  { %s4115_s20 = smov 0  }
   0x2 LB: > { %s4124_s21 = sadd.s32 4294967295, %s3981_s20   ;;  %s4126_s22 = sadd.s32 1, %s3981_s20   ;;  %s3981_s20 = sphi %s4115_s20, %s5304_s20   ;;  %s3977_s19 = sphi %s4113_s19, %s5303_s19   ;;  %s3973_s18 = sphi %s4111_s18, %s5302_s18  }
   0x3   : > { %s88_s23 = ssub.s32 %s3981_s20, %s4126_s22  ;;  %s91_s24 = sadd.s32 1, %s3977_s19 }
   0x4   : > { %p89_p0 = scmp.eq.s32.totalorder %s88_s23, 0  ;;  %p101_p1 = scmp.ne.s32.totalorder %s3977_s19, %s3973_s18 }
   0x5   : > { %p102_p2 = scmp.eq.s32.totalorder %s4124_s21, 1  ;;  %p3326_p3 = scmp.ge.s32.totalorder %s3981_s20, 1 }
   0x6   : > { %s4134_s25 = scalar_select %p89_p0, %s3977_s19, %s91_s24  }
   0x7   : > { %p4136_p4 = por %p102_p2, %p101_p1  ;;  %p201_p5 = scmp.lt.s32.totalorder %s3981_s20, 3 }
   0x9   : > { %p202_p6 = pnand %p3326_p3, %p201_p5 }
   0xa   : > { %s4141_s27 = sshll.u32 (!%p202_p6), %s4124_s21, 5  ;;  %vm322_vm0 = vcmask (!%p202_p6), 162816   ;;  %v4146_v0 = vld [vmem:[%s5279_s1] sm:$0xff] (!%p202_p6)  ;;  %v4079_v1 = vmov (!%p202_p6), 0   ;;  %v306_v3 = vld [vmem:[%s5280_s2 + $0x10] sm:$0xff] (!%p202_p6)  ;;  %v305_v4 = vld [vmem:[%s5280_s2 + $0x8] sm:$0xff] (!%p202_p6) }
   0xb   : > { %205 = sbr.rel (%p202_p6) target bundleno = 3227 (0xc9b), region = 32  ;;  %p245_p7 = scmp.lt.s32.totalorder (!%p202_p6), %s4141_s27, 37  ;;  %3497 = vmatprep.mubr.msk.f32.mxu0 (!%p202_p6), %vm322_vm0, %v4146_v0  ;;  %3825 = vset.pattern.permute.xlu0 (!%p202_p6), %v4079_v1  ;;  %v304_v2 = vld [vmem:[%s5280_s2] sm:$0xff] (!%p202_p6)  ;;  %v520_v5 = vld [vmem:[%s5280_s2 + $0x18] sm:$0xff] (!%p202_p6)  ;;  %vm4171_vm1 = vmpackc.low (!%p202_p6), %vm322_vm0, %vm322_vm0  ;;  %v4080_v6 = vmov (!%p202_p6), 0.0   ;;  %vm538_vm2 = vcmask (!%p202_p6), 195584  }
   0xc   : > { %309 = vperm.xlu0 (!%p202_p6), %3825, %v304_v2   ;;  %3826 = vset.pattern.permute.xlu1 (!%p202_p6), %v4079_v1  ;;  %v521_v7 = vld [vmem:[%s5280_s2 + $0x20] sm:$0xff] (!%p202_p6)  ;;  %v522_v8 = vld [vmem:[%s5280_s2 + $0x28] sm:$0xff] (!%p202_p6)  ;;  %v640_v18 = vld [vmem:[%s5280_s2 + $0x30] sm:$0xff] (!%p202_p6)  ;;  %s225_s10 = sand.u32 (!%p202_p6), 1, %s3973_s18  }
   0xd   : > { %319 = vperm.xlu1 (!%p202_p6), %3826, %v306_v3   ;;  %v641_v21 = vld [vmem:[%s5280_s2 + $0x38] sm:$0xff] (!%p202_p6)  ;;  %v642_v25 = vld [vmem:[%s5280_s2 + $0x40] sm:$0xff] (!%p202_p6)  ;;  %v759_v27 = vld [vmem:[%s5280_s2 + $0x48] sm:$0xff] (!%p202_p6)  ;;  %612 = vmatprep.mubr.f32.mxu1 (!%p202_p6), %v4080_v6  ;;  %s4672_s11 = sshll.u32 (!%p202_p6), %s225_s10, 8 }
   0xe   : > { %v760_v28 = vld [vmem:[%s5280_s2 + $0x50] sm:$0xff] (!%p202_p6)  ;;  %v761_v31 = vld [vmem:[%s5280_s2 + $0x58] sm:$0xff] (!%p202_p6)  ;;  %v878_v35 = vld [vmem:[%s5280_s2 + $0x60] sm:$0xff] (!%p202_p6)  ;;  %s4675_s12 = scalar_lea.vmem (!%p202_p6), [#allocation2], %s4672_s11   ;;  %s4742_s18 = scalar_lea.vmem (!%p202_p6), [#allocation3], %s4672_s11  }
   0xf   : > { %v879_v37 = vld [vmem:[%s5280_s2 + $0x68] sm:$0xff] (!%p202_p6)  ;;  %v880_v38 = vld [vmem:[%s5280_s2 + $0x70] sm:$0xff] (!%p202_p6)  ;;  %v997_v41 = vld [vmem:[%s5280_s2 + $0x78] sm:$0xff] (!%p202_p6)  ;;  %s4815_s13 = scalar_lea.vmem (!%p202_p6), [#allocation4], %s4672_s11  }
  0x10   : > { %314 = vperm.xlu0 (!%p202_p6), %3825, %v305_v4   ;;  %v998_v45 = vld [vmem:[%s5280_s2 + $0x80] sm:$0xff] (!%p202_p6)  ;;  %v999_v47 = vld [vmem:[%s5280_s2 + $0x88] sm:$0xff] (!%p202_p6)  ;;  %v1407_v48 = vld [vmem:[%s5280_s2 + $0x90] sm:$0xff] (!%p202_p6) }
  0x11   : > { %525 = vperm.xlu1 (!%p202_p6), %3826, %v520_v5   ;;  %v1408_v51 = vld [vmem:[%s5280_s2 + $0x98] sm:$0xff] (!%p202_p6)  ;;  %v1409_v55 = vld [vmem:[%s5280_s2 + $0xa0] sm:$0xff] (!%p202_p6)  ;;  %v1615_v57 = vld [vmem:[%s5280_s2 + $0xa8] sm:$0xff] (!%p202_p6) }
  0x12   : > { %s246_s9 = scalar_select %p245_p7, %s4141_s27, 37  ;;  %v1616_v58 = vld [vmem:[%s5280_s2 + $0xb0] sm:$0xff]  ;;  %v1617_v61 = vld [vmem:[%s5280_s2 + $0xb8] sm:$0xff]  ;;  %v1823_v2 = vld [vmem:[%s5280_s2 + $0xc0] sm:$0xff] }
  0x13   : > { %v1824_v4 = vld [vmem:[%s5280_s2 + $0xc8] sm:$0xff]  ;;  %v1825_v5 = vld [vmem:[%s5280_s2 + $0xd0] sm:$0xff]  ;;  %s3456_s15 = sshll.u32 (%p4136_p4), %s4124_s21, 8 }
  0x14   : > { %s3331_s14 = sshll.u32 %s246_s9, 3  ;;  %530 = vperm.xlu0 %3825, %v521_v7   ;;  %s4888_s20 = scalar_lea.vmem (%p4136_p4), %s5281_s3, %s3456_s15  }
  0x15   : > { %s4167_s17 = scalar_lea.vmem %s5278_s0, %s3331_s14  ;;  %535 = vperm.xlu1 %3826, %v522_v8   ;;  %s2368_s14 = ssub.s32 (%p4136_p4), 38, %s4141_s27 }
  0x16   : > { %v285_v9 = vld [vmem:[%s4167_s17 + $0x80] sm:$0xff]  ;;  %v286_v10 = vld [vmem:[%s4167_s17 + $0x88] sm:$0xff]  ;;  %v287_v14 = vld [vmem:[%s4167_s17 + $0x90] sm:$0xff]  ;;  %p2369_p8 = scmp.lt.s32.totalorder (%p4136_p4), %s2368_s14, 32 }
  0x17   : > { %v269_v11 = vld [vmem:[%s4167_s17] sm:$0xff]  ;;  %v3503_v12 = vpack.c.bf16 %v286_v10, %v285_v9  ;;  %v270_v13 = vld [vmem:[%s4167_s17 + $0x8] sm:$0xff]  ;;  %v288_v15 = vld [vmem:[%s4167_s17 + $0x98] sm:$0xff] }
  0x18   : > { %v3506_v16 = vpack.c.bf16 %v270_v13, %v269_v11  ;;  %v3509_v17 = vpack.c.bf16 %v288_v15, %v287_v14  ;;  %v271_v19 = vld [vmem:[%s4167_s17 + $0x10] sm:$0xff]  ;;  %v272_v20 = vld [vmem:[%s4167_s17 + $0x18] sm:$0xff]  ;;  %v289_v22 = vld [vmem:[%s4167_s17 + $0xa0] sm:$0xff]  ;;  %645 = vperm.xlu0 %3825, %v640_v18  }
  0x19   : > { %3505 = vmatprep.subr.msk.bf16.mxu0 %vm4171_vm1, %v3503_v12  ;;  %v290_v23 = vld [vmem:[%s4167_s17 + $0xa8] sm:$0xff]  ;;  %v3512_v24 = vpack.c.bf16 %v272_v20, %v271_v19  ;;  %650 = vperm.xlu1 %3826, %v641_v21   ;;  %v273_v29 = vld [vmem:[%s4167_s17 + $0x20] sm:$0xff]  ;;  %v291_v32 = vld [vmem:[%s4167_s17 + $0xb0] sm:$0xff] }
  0x1a   : > { %3508 = vmatpush3.bf16.xpose.msk.msra.mxu0 %vm4171_vm1, %v3506_v16  ;;  %v3515_v26 = vpack.c.bf16 %v290_v23, %v289_v22  ;;  %v274_v30 = vld [vmem:[%s4167_s17 + $0x28] sm:$0xff]  ;;  %v292_v33 = vld [vmem:[%s4167_s17 + $0xb8] sm:$0xff]  ;;  %v275_v39 = vld [vmem:[%s4167_s17 + $0x30] sm:$0xff] }
  0x1b   : > { %3511 = vmatprep.subr.msk.bf16.mxu0 %vm4171_vm1, %v3509_v17  ;;  %v3518_v34 = vpack.c.bf16 %v274_v30, %v273_v29  ;;  %v3521_v36 = vpack.c.bf16 %v292_v33, %v291_v32  ;;  %v276_v40 = vld [vmem:[%s4167_s17 + $0x38] sm:$0xff]  ;;  %v293_v42 = vld [vmem:[%s4167_s17 + $0xc0] sm:$0xff]  ;;  %v294_v43 = vld [vmem:[%s4167_s17 + $0xc8] sm:$0xff] }
  0x1c   : > { %655 = vperm.xlu0 %3825, %v642_v25   ;;  %v3524_v44 = vpack.c.bf16 %v276_v40, %v275_v39  ;;  %v3527_v46 = vpack.c.bf16 %v294_v43, %v293_v42  ;;  %v277_v49 = vld [vmem:[%s4167_s17 + $0x40] sm:$0xff]  ;;  %v278_v50 = vld [vmem:[%s4167_s17 + $0x48] sm:$0xff]  ;;  %v295_v52 = vld [vmem:[%s4167_s17 + $0xd0] sm:$0xff] }
  0x1d   : > { %764 = vperm.xlu1 %3826, %v759_v27   ;;  %v296_v53 = vld [vmem:[%s4167_s17 + $0xd8] sm:$0xff]  ;;  %v3530_v54 = vpack.c.bf16 %v278_v50, %v277_v49  ;;  %v279_v59 = vld [vmem:[%s4167_s17 + $0x50] sm:$0xff]  ;;  %v297_v62 = vld [vmem:[%s4167_s17 + $0xe0] sm:$0xff] }
  0x1e   : > { %v3533_v56 = vpack.c.bf16 %v296_v53, %v295_v52  ;;  %v280_v60 = vld [vmem:[%s4167_s17 + $0x58] sm:$0xff]  ;;  %v298_v63 = vld [vmem:[%s4167_s17 + $0xe8] sm:$0xff]  ;;  %v281_v7 = vld [vmem:[%s4167_s17 + $0x60] sm:$0xff] }
  0x1f   : > { %v3536_v1 = vpack.c.bf16 %v280_v60, %v279_v59  ;;  %v3539_v3 = vpack.c.bf16 %v298_v63, %v297_v62  ;;  %v282_v8 = vld [vmem:[%s4167_s17 + $0x68] sm:$0xff]  ;;  %v299_v9 = vld [vmem:[%s4167_s17 + $0xf0] sm:$0xff]  ;;  %v300_v10 = vld [vmem:[%s4167_s17 + $0xf8] sm:$0xff] }
  0x20   : > { %769 = vperm.xlu0 %3825, %v760_v28   ;;  %v3542_v11 = vpack.c.bf16 %v282_v8, %v281_v7  ;;  %v3545_v12 = vpack.c.bf16 %v300_v10, %v299_v9  ;;  %v283_v13 = vld [vmem:[%s4167_s17 + $0x70] sm:$0xff]  ;;  %v284_v14 = vld [vmem:[%s4167_s17 + $0x78] sm:$0xff]  ;;  %v4311_v16 = vld [vmem:[%s5279_s1 + $0x8] sm:$0xff] }
  0x21   : > { %774 = vperm.xlu1 %3826, %v761_v31   ;;  %v3548_v15 = vpack.c.bf16 %v284_v14, %v283_v13  ;;  %v4320_v17 = vld [vmem:[%s5279_s1 + $0x10] sm:$0xff]  ;;  %v4353_v42 = vld [vmem:[%s5279_s1 + $0x20] sm:$0xff]  ;;  %v4361_v43 = vld [vmem:[%s5279_s1 + $0x28] sm:$0xff] }
  0x22   : > { %3514 = vmatpush3.bf16.xpose.msk.msra.mxu0 %vm4171_vm1, %v3512_v24  ;;  %v4397_v7 = vld [vmem:[%s5279_s1 + $0x40] sm:$0xff] }
  0x23   : > { %3517 = vmatprep.subr.msk.bf16.mxu0 %vm4171_vm1, %v3515_v26 }
  0x24   : > { %883 = vperm.xlu0 %3825, %v878_v35  }
  0x25   : > { %888 = vperm.xlu1 %3826, %v879_v37  }
  0x28   : > { %893 = vperm.xlu0 %3825, %v880_v38  }
  0x29   : > { %1002 = vperm.xlu1 %3826, %v997_v41   ;;  %v4345_v41 = vld [vmem:[%s5279_s1 + $0x18] sm:$0xff] }
  0x2a   : > { %3520 = vmatpush3.bf16.xpose.msk.msra.mxu0 %vm4171_vm1, %v3518_v34 }
  0x2b   : > { %3523 = vmatprep.subr.msk.bf16.mxu0 %vm4171_vm1, %v3521_v36 }
  0x2c   : > { %1007 = vperm.xlu0 %3825, %v998_v45  }
  0x2d   : > { %1012 = vperm.xlu1 %3826, %v999_v47  }
  0x30   : > { %1412 = vperm.xlu0 %3825, %v1407_v48  }
  0x31   : > { %1417 = vperm.xlu1 %3826, %v1408_v51  }
  0x32   : > { %3526 = vmatpush3.bf16.xpose.msk.msra.mxu0 %vm4171_vm1, %v3524_v44 }
  0x33   : > { %3529 = vmatprep.subr.msk.bf16.mxu0 %vm4171_vm1, %v3527_v46 }
  0x34   : > { %1422 = vperm.xlu0 %3825, %v1409_v55  }
  0x35   : > { %1620 = vperm.xlu1 %3826, %v1615_v57  }
  0x38   : > { %1625 = vperm.xlu0 %3825, %v1616_v58  }
  0x39   : > { %1630 = vperm.xlu1 %3826, %v1617_v61  }
  0x3a   : > { %3532 = vmatpush3.bf16.xpose.msk.msra.mxu0 %vm4171_vm1, %v3530_v54 }
  0x3b   : > { %3535 = vmatprep.subr.msk.bf16.mxu0 %vm4171_vm1, %v3533_v56 }
  0x3c   : > { %1828 = vperm.xlu0 %3825, %v1823_v2  }
  0x3d   : > { %1833 = vperm.xlu1 %3826, %v1824_v4   ;;  %v4381_v4 = vld [vmem:[%s5279_s1 + $0x30] sm:$0xff] }
  0x40   : > { %1838 = vperm.xlu0 %3825, %v1825_v5   ;;  %v4389_v5 = vld [vmem:[%s5279_s1 + $0x38] sm:$0xff] }
  0x42   : > { %3538 = vmatpush3.bf16.xpose.msk.msra.mxu0 %vm4171_vm1, %v3536_v1 }
  0x43   : > { %3541 = vmatprep.subr.msk.bf16.mxu0 %vm4171_vm1, %v3539_v3 }
  0x4a   : > { %3544 = vmatpush3.bf16.xpose.msk.msra.mxu0 %vm4171_vm1, %v3542_v11 }
  0x4b   : > { %3547 = vmatprep.subr.msk.bf16.mxu0 %vm4171_vm1, %v3545_v12 }
  0x52   : > { %3550 = vmatpush3.bf16.xpose.msk.msra.mxu0 %vm4171_vm1, %v3548_v15 }
  0x59   : > { %3498 = vmatmul.mubr.msk.f32.vlgmr.msra.gmra.mrb[0].mxu0 %vm322_vm0, %v4146_v0 }
  0x5a   : > { %3499 = vmatprep.mubr.msk.f32.mxu0 %vm322_vm0, %v4311_v16 }
  0x5d   : > { %3500 = vmatmul.mubr.msk.f32.gmra.mrb[2].mxu0 %vm322_vm0, %v4311_v16 }
  0x5e   : > { %3501 = vmatprep.mubr.msk.f32.mxu0 %vm322_vm0, %v4320_v17 }
  0x61   : > { %3502 = vmatmul.mubr.msk.f32.gmra.mrb[4].mxu0 %vm322_vm0, %v4320_v17 }
  0x62   : > { %1290 = vmatprep.mubr.f32.mxu0 %v4080_v6 }
  0x8b   : > { %v4330_v18 = vpop.permute.xlu0 %309 }
  0x8c   : > { %v4338_v33 = vpop.permute.xlu1 %319 }
  0x8f   : > { %v4333_v22 = vpop.permute.xlu0 %314 }
  0x90   : > { %v4366_v46 = vpop.permute.xlu1 %525 }
  0x93   : > { %v4369_v48 = vpop.permute.xlu0 %530 }
  0x94   : > { %v4374_v59 = vpop.permute.xlu1 %535 }
  0x97   : > { %v4402_v10 = vpop.permute.xlu0 %645 }
  0x98   : > { %v4405_v12 = vpop.permute.xlu1 %650 }
 0x12c   : > { %v494_v19 = vpop.f32.mrb[0].mxu0 }
 0x12d   : > { %v496_v20 = vpop.f32.mrb[1].mxu0  ;;  %v495_v21 = vadd.f32 %v494_v19, %v4330_v18 }
 0x12e   : > { %v497_v23 = vadd.f32 %v496_v20, %v4330_v18 }
 0x12f   : > { %v511_v28 = vmax.f32 %v495_v21, 0.0 }
 0x130   : > { %v500_v24 = vpop.f32.mrb[2].mxu0  ;;  %v512_v30 = vmax.f32 %v497_v23, 0.0 }
 0x131   : > { %v501_v25 = vadd.f32 %v500_v24, %v4333_v22  ;;  %v502_v26 = vpop.f32.mrb[3].mxu0 }
 0x132   : > { %v503_v27 = vadd.f32 %v502_v26, %v4333_v22 }
 0x133   : > { %v513_v29 = vmax.f32 %v501_v25, 0.0 }
 0x134   : > { %v514_v31 = vmax.f32 %v503_v27, 0.0  ;;  %v506_v32 = vpop.f32.mrb[4].mxu0  ;;  %v4410_v27 = vpop.permute.xlu0 %655 }
 0x135   : > { %v508_v34 = vpop.f32.mrb[5].mxu0  ;;  %v3553_v35 = vpack.c.bf16 %v513_v29, %v511_v28  ;;  %v507_v38 = vadd.f32 %v506_v32, %v4338_v33 }
 0x136   : > { %v509_v36 = vadd.f32 %v508_v34, %v4338_v33  ;;  %v3551_v37 = vpack.c.bf16 %v514_v31, %v512_v30 }
 0x137   : > { %v515_v40 = vmax.f32 %v507_v38, 0.0  ;;  %v758_v38 = vld [vmem:[%s5279_s1 + $0x58] sm:$0xff] }
 0x138   : > { %v516_v39 = vmax.f32 %v509_v36, 0.0  ;;  %3552 = vmatprep.subr.bf16.mxu1 %v3551_v37  ;;  %v756_v36 = vld [vmem:[%s5279_s1 + $0x48] sm:$0xff]  ;;  %v757_v37 = vld [vmem:[%s5279_s1 + $0x50] sm:$0xff] }
 0x139   : > { %3554 = vmatpush1.bf16.msra.mxu1 %v3553_v35 }
 0x13a   : > { %552 = vmatprep.subr.mxu1 %v516_v39 }
 0x13d   : > { %553 = vmatpush1.msra.mxu1 %v515_v40 }
 0x13e   : > { %3367 = vmatmul.mubr.msk.f32.vlgmr.msra.gmra.mrb[0].mxu1 %vm538_vm2, %v4345_v41 }
 0x13f   : > { %618 = vmatprep.mubr.f32.mxu1 %v4080_v6 }
 0x142   : > { %3368 = vmatmul.mubr.msk.f32.gmra.mrb[2].mxu1 %vm538_vm2, %v4353_v42 }
 0x143   : > { %624 = vmatprep.mubr.f32.mxu1 %v4080_v6 }
 0x146   : > { %3369 = vmatmul.mubr.msk.f32.gmra.mrb[4].mxu1 %vm538_vm2, %v4361_v43 }
 0x147   : > { %731 = vmatprep.mubr.f32.mxu1 %v4080_v6 }
 0x211   : > { %v614_v44 = vpop.f32.mrb[0].mxu1 }
 0x212   : > { %v616_v45 = vpop.f32.mrb[1].mxu1  ;;  %v615_v47 = vadd.f32 %v614_v44, %v4366_v46  ;;  %v765_v44 = vpop.permute.xlu1 %764 }
 0x213   : > { %v617_v49 = vadd.f32 %v616_v45, %v4366_v46 }
 0x214   : > { %v631_v54 = vmax.f32 %v615_v47, 0.0  ;;  %v770_v47 = vpop.permute.xlu0 %769 }
 0x215   : > { %v620_v50 = vpop.f32.mrb[2].mxu1  ;;  %v632_v56 = vmax.f32 %v617_v49, 0.0 }
 0x216   : > { %v621_v51 = vadd.f32 %v620_v50, %v4369_v48  ;;  %v622_v52 = vpop.f32.mrb[3].mxu1 }
 0x217   : > { %v623_v53 = vadd.f32 %v622_v52, %v4369_v48 }
 0x218   : > { %v633_v55 = vmax.f32 %v621_v51, 0.0 }
 0x219   : > { %v634_v57 = vmax.f32 %v623_v53, 0.0  ;;  %v626_v58 = vpop.f32.mrb[4].mxu1 }
 0x21a   : > { %v3557_v60 = vpack.c.bf16 %v633_v55, %v631_v54  ;;  %v628_v61 = vpop.f32.mrb[5].mxu1  ;;  %v627_v1 = vadd.f32 %v626_v58, %v4374_v59 }
 0x21b   : > { %v3555_v62 = vpack.c.bf16 %v634_v57, %v632_v56  ;;  %v629_v63 = vadd.f32 %v628_v61, %v4374_v59 }
 0x21c   : > { %v635_v3 = vmax.f32 %v627_v1, 0.0 }
 0x21d   : > { %v636_v2 = vmax.f32 %v629_v63, 0.0  ;;  %3556 = vmatprep.subr.bf16.mxu1 %v3555_v62 }
 0x21e   : > { %3558 = vmatpush1.bf16.msra.mxu1 %v3557_v60  ;;  %v775_v60 = vpop.permute.xlu1 %774 }
 0x21f   : > { %671 = vmatprep.subr.mxu1 %v636_v2 }
 0x222   : > { %672 = vmatpush1.msra.mxu1 %v635_v3 }
 0x223   : > { %3370 = vmatmul.mubr.msk.f32.vlgmr.msra.gmra.mrb[6].mxu1 %vm538_vm2, %v4381_v4 }
 0x224   : > { %737 = vmatprep.mubr.f32.mxu1 %v4080_v6 }
 0x227   : > { %3371 = vmatmul.mubr.msk.f32.gmra.mrb[8].mxu1 %vm538_vm2, %v4389_v5 }
 0x228   : > { %743 = vmatprep.mubr.f32.mxu1 %v4080_v6 }
 0x22b   : > { %3372 = vmatmul.mubr.msk.f32.gmra.mrb[10].mxu1 %vm538_vm2, %v4397_v7 }
 0x22c   : > { %850 = vmatprep.mubr.f32.mxu1 %v4080_v6 }
 0x2f6   : > { %v733_v8 = vpop.f32.mrb[6].mxu1 }
 0x2f7   : > { %v735_v9 = vpop.f32.mrb[7].mxu1  ;;  %v734_v11 = vadd.f32 %v733_v8, %v4402_v10 }
 0x2f8   : > { %v736_v13 = vadd.f32 %v735_v9, %v4402_v10  ;;  %v875_v9 = vld [vmem:[%s5279_s1 + $0x60] sm:$0xff] }
 0x2f9   : > { %v750_v21 = vmax.f32 %v734_v11, 0.0  ;;  %v876_v11 = vld [vmem:[%s5279_s1 + $0x68] sm:$0xff] }
 0x2fa   : > { %v739_v14 = vpop.f32.mrb[8].mxu1  ;;  %v751_v24 = vmax.f32 %v736_v13, 0.0  ;;  %v877_v13 = vld [vmem:[%s5279_s1 + $0x70] sm:$0xff] }
 0x2fb   : > { %v740_v15 = vadd.f32 %v739_v14, %v4405_v12  ;;  %v741_v19 = vpop.f32.mrb[9].mxu1 }
 0x2fc   : > { %v742_v20 = vadd.f32 %v741_v19, %v4405_v12  ;;  %v884_v19 = vpop.permute.xlu0 %883 }
 0x2fd   : > { %v752_v23 = vmax.f32 %v740_v15, 0.0 }
 0x2fe   : > { %v753_v25 = vmax.f32 %v742_v20, 0.0  ;;  %v745_v26 = vpop.f32.mrb[10].mxu1 }
 0x2ff   : > { %v4412_v28 = vpack.c.bf16 %v752_v23, %v750_v21  ;;  %v747_v29 = vpop.f32.mrb[11].mxu1  ;;  %v4420_v32 = vadd.f32 %v745_v26, %v4410_v27  ;;  %v889_v21 = vpop.permute.xlu1 %888 }
 0x300   : > { %v4414_v30 = vpack.c.bf16 %v753_v25, %v751_v24  ;;  %v4417_v31 = vadd.f32 %v747_v29, %v4410_v27 }
 0x301   : > { %v754_v35 = vmax.f32 %v4420_v32, 0.0 }
 0x302   : > { %v755_v34 = vmax.f32 %v4417_v31, 0.0  ;;  %3560 = vmatprep.subr.bf16.mxu1 %v4414_v30 }
 0x303   : > { %3562 = vmatpush1.bf16.msra.mxu1 %v4412_v28 }
 0x304   : > { %790 = vmatprep.subr.mxu1 %v755_v34 }
 0x307   : > { %791 = vmatpush1.msra.mxu1 %v754_v35 }
 0x308   : > { %3373 = vmatmul.mubr.msk.f32.vlgmr.msra.gmra.mrb[12].mxu1 %vm538_vm2, %v756_v36 }
 0x309   : > { %856 = vmatprep.mubr.f32.mxu1 %v4080_v6 }
 0x30c   : > { %3374 = vmatmul.mubr.msk.f32.gmra.mrb[14].mxu1 %vm538_vm2, %v757_v37 }
 0x30d   : > { %862 = vmatprep.mubr.f32.mxu1 %v4080_v6 }
 0x310   : > { %3375 = vmatmul.mubr.msk.f32.gmra.mrb[16].mxu1 %vm538_vm2, %v758_v38 }
 0x311   : > { %969 = vmatprep.mubr.f32.mxu1 %v4080_v6 }
 0x3db   : > { %v852_v39 = vpop.f32.mrb[12].mxu1 }
 0x3dc   : > { %v854_v40 = vpop.f32.mrb[13].mxu1  ;;  %v853_v45 = vadd.f32 %v852_v39, %v765_v44 }
 0x3dd   : > { %v855_v49 = vadd.f32 %v854_v40, %v765_v44  ;;  %v894_v44 = vpop.permute.xlu0 %893 }
 0x3de   : > { %v869_v54 = vmax.f32 %v853_v45, 0.0 }
 0x3df   : > { %v858_v50 = vpop.f32.mrb[14].mxu1  ;;  %v870_v56 = vmax.f32 %v855_v49, 0.0 }
 0x3e0   : > { %v859_v51 = vadd.f32 %v858_v50, %v770_v47  ;;  %v860_v52 = vpop.f32.mrb[15].mxu1 }
 0x3e1   : > { %v861_v53 = vadd.f32 %v860_v52, %v770_v47 }
 0x3e2   : > { %v871_v55 = vmax.f32 %v859_v51, 0.0 }
 0x3e3   : > { %v872_v57 = vmax.f32 %v861_v53, 0.0  ;;  %v864_v58 = vpop.f32.mrb[16].mxu1 }
 0x3e4   : > { %v3565_v61 = vpack.c.bf16 %v871_v55, %v869_v54  ;;  %v866_v62 = vpop.f32.mrb[17].mxu1  ;;  %v865_v2 = vadd.f32 %v864_v58, %v775_v60  ;;  %v994_v54 = vld [vmem:[%s5279_s1 + $0x78] sm:$0xff]  ;;  %v995_v55 = vld [vmem:[%s5279_s1 + $0x80] sm:$0xff] }
 0x3e5   : > { %v3563_v63 = vpack.c.bf16 %v872_v57, %v870_v56  ;;  %v867_v1 = vadd.f32 %v866_v62, %v775_v60  ;;  %v996_v56 = vld [vmem:[%s5279_s1 + $0x88] sm:$0xff]  ;;  %v1003_v57 = vpop.permute.xlu1 %1002 }
 0x3e6   : > { %v873_v8 = vmax.f32 %v865_v2, 0.0 }
 0x3e7   : > { %v874_v3 = vmax.f32 %v867_v1, 0.0  ;;  %3564 = vmatprep.subr.bf16.mxu1 %v3563_v63  ;;  %v1008_v1 = vpop.permute.xlu0 %1007 }
 0x3e8   : > { %3566 = vmatpush1.bf16.msra.mxu1 %v3565_v61 }
 0x3e9   : > { %909 = vmatprep.subr.mxu1 %v874_v3 }
 0x3ec   : > { %910 = vmatpush1.msra.mxu1 %v873_v8 }
 0x3ed   : > { %3376 = vmatmul.mubr.msk.f32.vlgmr.msra.gmra.mrb[18].mxu1 %vm538_vm2, %v875_v9 }
 0x3ee   : > { %975 = vmatprep.mubr.f32.mxu1 %v4080_v6 }
 0x3f1   : > { %3377 = vmatmul.mubr.msk.f32.gmra.mrb[20].mxu1 %vm538_vm2, %v876_v11 }
 0x3f2   : > { %981 = vmatprep.mubr.f32.mxu1 %v4080_v6 }
 0x3f5   : > { %3378 = vmatmul.mubr.msk.f32.gmra.mrb[22].mxu1 %vm538_vm2, %v877_v13 }
 0x3f6   : > { %1088 = vmatprep.mubr.f32.mxu1 %v4080_v6 }
 0x4c0   : > { %v971_v14 = vpop.f32.mrb[18].mxu1 }
 0x4c1   : > { %v973_v15 = vpop.f32.mrb[19].mxu1  ;;  %v972_v20 = vadd.f32 %v971_v14, %v884_v19  ;;  %v1013_v14 = vpop.permute.xlu1 %1012 }
 0x4c2   : > { %v974_v23 = vadd.f32 %v973_v15, %v884_v19 }
 0x4c3   : > { %v988_v36 = vmax.f32 %v972_v20, 0.0 }
 0x4c4   : > { %v977_v24 = vpop.f32.mrb[20].mxu1  ;;  %v989_v38 = vmax.f32 %v974_v23, 0.0 }
 0x4c5   : > { %v978_v25 = vadd.f32 %v977_v24, %v889_v21  ;;  %v979_v26 = vpop.f32.mrb[21].mxu1 }
 0x4c6   : > { %v980_v29 = vadd.f32 %v979_v26, %v889_v21 }
 0x4c7   : > { %v990_v37 = vmax.f32 %v978_v25, 0.0 }
 0x4c8   : > { %v991_v39 = vmax.f32 %v980_v29, 0.0  ;;  %v983_v40 = vpop.f32.mrb[22].mxu1 }
 0x4c9   : > { %v3569_v45 = vpack.c.bf16 %v990_v37, %v988_v36  ;;  %v985_v47 = vpop.f32.mrb[23].mxu1  ;;  %v984_v51 = vadd.f32 %v983_v40, %v894_v44 }
 0x4ca   : > { %v3567_v49 = vpack.c.bf16 %v991_v39, %v989_v38  ;;  %v986_v50 = vadd.f32 %v985_v47, %v894_v44 }
 0x4cb   : > { %v992_v53 = vmax.f32 %v984_v51, 0.0 }
 0x4cc   : > { %v993_v52 = vmax.f32 %v986_v50, 0.0  ;;  %3568 = vmatprep.subr.bf16.mxu1 %v3567_v49 }
 0x4cd   : > { %3570 = vmatpush1.bf16.msra.mxu1 %v3569_v45 }
 0x4ce   : > { %1028 = vmatprep.subr.mxu1 %v993_v52 }
 0x4d1   : > { %1029 = vmatpush1.msra.mxu1 %v992_v53 }
 0x4d2   : > { %3379 = vmatmul.mubr.msk.f32.vlgmr.msra.gmra.mrb[24].mxu1 %vm538_vm2, %v994_v54 }
 0x4d3   : > { %1094 = vmatprep.mubr.f32.mxu1 %v4080_v6 }
 0x4d6   : > { %3380 = vmatmul.mubr.msk.f32.gmra.mrb[26].mxu1 %vm538_vm2, %v995_v55 }
 0x4d7   : > { %1100 = vmatprep.mubr.f32.mxu1 %v4080_v6 }
 0x4da   : > { %3381 = vmatmul.mubr.msk.f32.gmra.mrb[28].mxu1 %vm538_vm2, %v996_v56 }
 0x4db   : > { %1201 = vmatprep.mubr.f32.mxu1 %v4080_v6 }
 0x5a5   : > { %v1090_v58 = vpop.f32.mrb[24].mxu1 }
 0x5a6   : > { %v1091_v60 = vadd.f32 %v1090_v58, %v1003_v57  ;;  %v1092_v61 = vpop.f32.mrb[25].mxu1 }
 0x5a7   : > { %v1093_v62 = vadd.f32 %v1092_v61, %v1003_v57 }
 0x5a8   : > { %v1107_v63 = vmul.f32 0.5, %v1091_v60 }
 0x5a9   : > { %v1108_v2 = vmul.f32 0.5, %v1093_v62  ;;  %v1096_v3 = vpop.f32.mrb[26].mxu1 }
 0x5aa   : > { %3827 = vtanh.f32 %v1107_v63  ;;  %v1097_v8 = vadd.f32 %v1096_v3, %v1008_v1  ;;  %v1098_v9 = vpop.f32.mrb[27].mxu1 }
 0x5ab   : > { %3829 = vtanh.f32 %v1108_v2  ;;  %v1099_v11 = vadd.f32 %v1098_v9, %v1008_v1 }
 0x5ac   : > { %v1109_v13 = vmul.f32 0.5, %v1097_v8 }
 0x5ad   : > { %v1110_v15 = vmul.f32 0.5, %v1099_v11  ;;  %v1102_v19 = vpop.f32.mrb[28].mxu1 }
 0x5ae   : > { %3831 = vtanh.f32 %v1109_v13  ;;  %v1103_v20 = vadd.f32 %v1102_v19, %v1013_v14  ;;  %v1104_v21 = vpop.f32.mrb[29].mxu1 }
 0x5af   : > { %3833 = vtanh.f32 %v1110_v15  ;;  %v1105_v23 = vadd.f32 %v1104_v21, %v1013_v14 }
 0x5b0   : > { %v1111_v24 = vmul.f32 0.5, %v1103_v20 }
 0x5b1   : > { %v1112_v25 = vmul.f32 0.5, %v1105_v23 }
 0x5b2   : > { %3835 = vtanh.f32 %v1111_v24 }
 0x5b3   : > { %3837 = vtanh.f32 %v1112_v25 }
 0x5b4   : > { %v3828_v26 = vpop.eup %3827 }
 0x5b5   : > { %v3830_v29 = vpop.eup %3829  ;;  %v1119_v36 = vadd.f32 1.0, %v3828_v26 }
 0x5b6   : > { %v1120_v37 = vadd.f32 1.0, %v3830_v29 }
 0x5b7   : > { %v1125_v38 = vmul.f32 0.5, %v1119_v36 }
 0x5b8   : > { %v3832_v39 = vpop.eup %3831  ;;  %v1126_v40 = vmul.f32 0.5, %v1120_v37 }
 0x5b9   : > { %v3834_v44 = vpop.eup %3833  ;;  %v1121_v45 = vadd.f32 1.0, %v3832_v39  ;;  %2064 = vxpose.xlu1.b32.start [1/3] (short) %v1125_v38, 128 }
 0x5ba   : > { %v1122_v47 = vadd.f32 1.0, %v3834_v44  ;;  %2096 = vxpose.xlu0.b32.start [1/3] (short) %v1126_v40, 128 }
 0x5bb   : > { %v1127_v49 = vmul.f32 0.5, %v1121_v45 }
 0x5bc   : > { %v3836_v50 = vpop.eup %3835  ;;  %v1128_v51 = vmul.f32 0.5, %v1122_v47  ;;  %v4535_v47 = vpop.permute.xlu0 %1412 }
 0x5bd   : > { %v3838_v52 = vpop.eup %3837  ;;  %v1123_v53 = vadd.f32 1.0, %v3836_v50  ;;  %v3573_v54 = vpack.c.bf16 %v1127_v49, %v1125_v38  ;;  %2065 = vxpose.xlu1.b32.cont [2/3] (short) %v1127_v49, 128  ;;  %v4538_v50 = vpop.permute.xlu1 %1417 }
 0x5be   : > { %v1124_v55 = vadd.f32 1.0, %v3838_v52  ;;  %2097 = vxpose.xlu0.b32.cont [2/3] (short) %v1128_v51, 128  ;;  %v3571_v56 = vpack.c.bf16 %v1128_v51, %v1126_v40 }
 0x5bf   : > { %v1129_v57 = vmul.f32 0.5, %v1123_v53 }
 0x5c0   : > { %v1130_v58 = vmul.f32 0.5, %v1124_v55  ;;  %3572 = vmatprep.subr.bf16.mxu1 %v3571_v56 }
 0x5c1   : > { %2066 = vxpose.xlu1.b32.end [3/3] (short) %v1129_v57, 128  ;;  %3574 = vmatpush1.bf16.msra.mxu1 %v3573_v54 }
 0x5c2   : > { %2098 = vxpose.xlu0.b32.end [3/3] (short) %v1130_v58, 128  ;;  %1141 = vmatprep.subr.mxu1 %v1130_v58 }
 0x5c5   : > { %1142 = vmatpush1.msra.mxu1 %v1129_v57 }
 0x5c6   : > { %3382 = vmatmul.mubr.msk.f32.vlgmr.msra.gmra.mrb[30].mxu1 %vm538_vm2, %v4146_v0 }
 0x5c7   : > { %1207 = vmatprep.mubr.f32.mxu1 %v4080_v6 }
 0x5ca   : > { %3383 = vmatmul.mubr.msk.f32.gmra.mrb[32].mxu1 %vm538_vm2, %v4311_v16 }
 0x5cb   : > { %1213 = vmatprep.mubr.f32.mxu1 %v4080_v6 }
 0x5ce   : > { %3384 = vmatmul.mubr.msk.f32.gmra.mrb[34].mxu1 %vm538_vm2, %v4320_v17 }
 0x5cf   : > { %1379 = vmatprep.mubr.f32.mxu1 %v4080_v6 }
 0x699   : > { %v1203_v60 = vpop.f32.mrb[30].mxu1 }
 0x69a   : > { %v1205_v61 = vpop.f32.mrb[31].mxu1  ;;  %v1204_v62 = vadd.f32 %v1203_v60, %v4330_v18 }
 0x69b   : > { %v1206_v63 = vadd.f32 %v1205_v61, %v4330_v18  ;;  %v4546_v61 = vpop.permute.xlu0 %1422 }
 0x69c   : > { %v1220_v16 = vmax.f32 %v1204_v62, 0.0 }
 0x69d   : > { %v1209_v1 = vpop.f32.mrb[32].mxu1  ;;  %v1221_v9 = vmax.f32 %v1206_v63, 0.0 }
 0x69e   : > { %v1210_v0 = vadd.f32 %v1209_v1, %v4333_v22  ;;  %v1211_v2 = vpop.f32.mrb[33].mxu1 }
 0x69f   : > { %v1212_v3 = vadd.f32 %v1211_v2, %v4333_v22  ;;  %v4508_v22 = vld [vmem:[%s5279_s1 + $0x90] sm:$0xff] }
 0x6a0   : > { %v1222_v8 = vmax.f32 %v1210_v0, 0.0 }
 0x6a1   : > { %v1223_v11 = vmax.f32 %v1212_v3, 0.0  ;;  %v1215_v13 = vpop.f32.mrb[34].mxu1 }
 0x6a2   : > { %v3577_v17 = vpack.c.bf16 %v1222_v8, %v1220_v16  ;;  %v1217_v14 = vpop.f32.mrb[35].mxu1  ;;  %v1216_v20 = vadd.f32 %v1215_v13, %v4338_v33  ;;  %v4558_v16 = vld [vmem:[%s5279_s1 + $0xa8] sm:$0xff] }
 0x6a3   : > { %v3575_v15 = vpack.c.bf16 %v1223_v11, %v1221_v9  ;;  %v1218_v19 = vadd.f32 %v1217_v14, %v4338_v33  ;;  %v4516_v33 = vld [vmem:[%s5279_s1 + $0x98] sm:$0xff] }
 0x6a4   : > { %v1224_v18 = vmax.f32 %v1216_v20, 0.0 }
 0x6a5   : > { %v1225_v21 = vmax.f32 %v1218_v19, 0.0  ;;  %3576 = vmatprep.subr.bf16.mxu0 %v3575_v15 }
 0x6a6   : > { %3578 = vmatpush1.bf16.msra.mxu0 %v3577_v17 }
 0x6a7   : > { %1230 = vmatprep.subr.mxu0 %v1225_v21 }
 0x6aa   : > { %1231 = vmatpush1.msra.mxu0 %v1224_v18 }
 0x6ab   : > { %3385 = vmatmul.mubr.msk.f32.vlgmr.msra.gmra.mrb[6].mxu0 %vm538_vm2, %v4345_v41  ;;  %3584 = vmatprep.subr.bf16.mxu0 %v4414_v30  ;;  %v4524_v41 = vld [vmem:[%s5279_s1 + $0xa0] sm:$0xff] }
 0x6ac   : > { %3586 = vmatpush1.bf16.msra.mxu0 %v4412_v28  ;;  %1296 = vmatprep.mubr.f32.mxu0 %v4080_v6 }
 0x6ad   : > { %1438 = vmatprep.subr.mxu0 %v755_v34 }
 0x6af   : > { %3386 = vmatmul.mubr.msk.f32.gmra.mrb[8].mxu0 %vm538_vm2, %v4353_v42 }
 0x6b0   : > { %1439 = vmatpush1.msra.mxu0 %v754_v35  ;;  %1302 = vmatprep.mubr.f32.mxu0 %v4080_v6 }
 0x6b3   : > { %3387 = vmatmul.mubr.msk.f32.gmra.mrb[10].mxu0 %vm538_vm2, %v4361_v43 }
 0x6b4   : > { %1498 = vmatprep.mubr.f32.mxu0 %v4080_v6 }
 0x6b7   : > { %3391 = vmatmul.mubr.msk.f32.vlgmr.msra.gmra.mrb[12].mxu0 %vm538_vm2, %v4508_v22 }
 0x6b8   : > { %1504 = vmatprep.mubr.f32.mxu0 %v4080_v6 }
 0x6bb   : > { %3392 = vmatmul.mubr.msk.f32.gmra.mrb[14].mxu0 %vm538_vm2, %v4516_v33 }
 0x6bc   : > { %1510 = vmatprep.mubr.f32.mxu0 %v4080_v6 }
 0x6bf   : > { %3393 = vmatmul.mubr.msk.f32.gmra.mrb[16].mxu0 %vm538_vm2, %v4524_v41 }
 0x6c0   : > { %1706 = vmatprep.mubr.f32.mxu0 %v4080_v6 }
 0x77e   : > { %v1292_v42 = vpop.f32.mrb[6].mxu0 }
 0x77f   : > { %v1294_v43 = vpop.f32.mrb[7].mxu0  ;;  %v1293_v28 = vadd.f32 %v1292_v42, %v4366_v46 }
 0x780   : > { %v1295_v30 = vadd.f32 %v1294_v43, %v4366_v46 }
 0x781   : > { %v1309_v23 = vmax.f32 %v1293_v28, 0.0 }
 0x782   : > { %v1298_v31 = vpop.f32.mrb[8].mxu0  ;;  %v1310_v25 = vmax.f32 %v1295_v30, 0.0 }
 0x783   : > { %v1299_v32 = vadd.f32 %v1298_v31, %v4369_v48  ;;  %v1300_v34 = vpop.f32.mrb[9].mxu0 }
 0x784   : > { %v1301_v35 = vadd.f32 %v1300_v34, %v4369_v48 }
 0x785   : > { %v1311_v24 = vmax.f32 %v1299_v32, 0.0 }
 0x786   : > { %v1312_v26 = vmax.f32 %v1301_v35, 0.0  ;;  %v1304_v29 = vpop.f32.mrb[10].mxu0 }
 0x787   : > { %v3581_v36 = vpack.c.bf16 %v1311_v24, %v1309_v23  ;;  %v1306_v37 = vpop.f32.mrb[11].mxu0  ;;  %v1305_v40 = vadd.f32 %v1304_v29, %v4374_v59  ;;  %v4586_v24 = vpop.permute.xlu1 %1620 }
 0x788   : > { %v3579_v38 = vpack.c.bf16 %v1312_v26, %v1310_v25  ;;  %v1307_v39 = vadd.f32 %v1306_v37, %v4374_v59  ;;  %v4589_v26 = vpop.permute.xlu0 %1625 }
 0x789   : > { %v1313_v48 = vmax.f32 %v1305_v40, 0.0 }
 0x78a   : > { %v1314_v44 = vmax.f32 %v1307_v39, 0.0  ;;  %3580 = vmatprep.subr.bf16.mxu1 %v3579_v38  ;;  %v1500_v46 = vpop.f32.mrb[12].mxu0 }
 0x78b   : > { %3582 = vmatpush1.bf16.msra.mxu1 %v3581_v36  ;;  %v1502_v45 = vpop.f32.mrb[13].mxu0  ;;  %v1501_v49 = vadd.f32 %v1500_v46, %v4535_v47 }
 0x78c   : > { %1319 = vmatprep.subr.mxu1 %v1314_v44  ;;  %v1503_v51 = vadd.f32 %v1502_v45, %v4535_v47 }
 0x78d   : > { %v1600_v55 = vmax.f32 %v1501_v49, 0.0 }
 0x78e   : > { %v1506_v52 = vpop.f32.mrb[14].mxu0  ;;  %v1601_v57 = vmax.f32 %v1503_v51, 0.0 }
 0x78f   : > { %v1507_v53 = vadd.f32 %v1506_v52, %v4538_v50  ;;  %1320 = vmatpush1.msra.mxu1 %v1313_v48  ;;  %v1508_v59 = vpop.f32.mrb[15].mxu0  ;;  %v4597_v48 = vpop.permute.xlu1 %1630 }
 0x790   : > { %v1509_v54 = vadd.f32 %v1508_v59, %v4538_v50  ;;  %3388 = vmatmul.mubr.msk.f32.vlgmr.msra.gmra.mrb[36].mxu1 %vm538_vm2, %v4381_v4 }
 0x791   : > { %v1604_v56 = vmax.f32 %v1507_v53, 0.0  ;;  %1385 = vmatprep.mubr.f32.mxu1 %v4080_v6 }
 0x792   : > { %v1605_v58 = vmax.f32 %v1509_v54, 0.0  ;;  %v1512_v60 = vpop.f32.mrb[16].mxu0 }
 0x793   : > { %v3593_v62 = vpack.c.bf16 %v1604_v56, %v1600_v55  ;;  %v1514_v63 = vpop.f32.mrb[17].mxu0  ;;  %v1513_v2 = vadd.f32 %v1512_v60, %v4546_v61  ;;  %v4609_v55 = vld [vmem:[%s5279_s1 + $0xc0] sm:$0xff] }
 0x794   : > { %v3591_v1 = vpack.c.bf16 %v1605_v58, %v1601_v57  ;;  %v1515_v0 = vadd.f32 %v1514_v63, %v4546_v61  ;;  %3389 = vmatmul.mubr.msk.f32.gmra.mrb[38].mxu1 %vm538_vm2, %v4389_v5  ;;  %v4567_v5 = vld [vmem:[%s5279_s1 + $0xb0] sm:$0xff] }
 0x795   : > { %1391 = vmatprep.mubr.f32.mxu1 %v4080_v6  ;;  %v1608_v3 = vmax.f32 %v1513_v2, 0.0 }
 0x796   : > { %v1609_v4 = vmax.f32 %v1515_v0, 0.0  ;;  %3592 = vmatprep.subr.bf16.mxu0 %v3591_v1 }
 0x797   : > { %3594 = vmatpush1.bf16.msra.mxu0 %v3593_v62 }
 0x798   : > { %3390 = vmatmul.mubr.msk.f32.gmra.mrb[40].mxu1 %vm538_vm2, %v4397_v7  ;;  %1646 = vmatprep.subr.mxu0 %v1609_v4  ;;  %v4575_v7 = vld [vmem:[%s5279_s1 + $0xb8] sm:$0xff] }
 0x799   : > { %1581 = vmatprep.mubr.f32.mxu1 %v4080_v6 }
 0x79b   : > { %1647 = vmatpush1.msra.mxu0 %v1608_v3 }
 0x79c   : > { %3397 = vmatmul.mubr.msk.f32.vlgmr.msra.gmra.mrb[18].mxu0 %vm538_vm2, %v4558_v16 }
 0x79d   : > { %1712 = vmatprep.mubr.f32.mxu0 %v4080_v6 }
 0x7a0   : > { %3398 = vmatmul.mubr.msk.f32.gmra.mrb[20].mxu0 %vm538_vm2, %v4567_v5 }
 0x7a1   : > { %1718 = vmatprep.mubr.f32.mxu0 %v4080_v6 }
 0x7a4   : > { %3399 = vmatmul.mubr.msk.f32.gmra.mrb[22].mxu0 %vm538_vm2, %v4575_v7 }
 0x7a5   : > { %1914 = vmatprep.mubr.f32.mxu0 %v4080_v6 }
 0x863   : > { %v1381_v8 = vpop.f32.mrb[36].mxu1 }
 0x864   : > { %v1383_v9 = vpop.f32.mrb[37].mxu1  ;;  %v1382_v11 = vadd.f32 %v1381_v8, %v4402_v10 }
 0x865   : > { %v1384_v13 = vadd.f32 %v1383_v9, %v4402_v10 }
 0x866   : > { %v1398_v20 = vmax.f32 %v1382_v11, 0.0 }
 0x867   : > { %v1387_v17 = vpop.f32.mrb[38].mxu1  ;;  %v1399_v18 = vmax.f32 %v1384_v13, 0.0 }
 0x868   : > { %v1388_v14 = vadd.f32 %v1387_v17, %v4405_v12  ;;  %v1389_v15 = vpop.f32.mrb[39].mxu1 }
 0x869   : > { %v1390_v19 = vadd.f32 %v1389_v15, %v4405_v12 }
 0x86a   : > { %v1400_v21 = vmax.f32 %v1388_v14, 0.0 }
 0x86b   : > { %v1401_v42 = vmax.f32 %v1390_v19, 0.0  ;;  %v1393_v43 = vpop.f32.mrb[40].mxu1  ;;  %v4636_v19 = vpop.permute.xlu0 %1828 }
 0x86c   : > { %v3589_v28 = vpack.c.bf16 %v1400_v21, %v1398_v20  ;;  %v1395_v30 = vpop.f32.mrb[41].mxu1  ;;  %v1394_v34 = vadd.f32 %v1393_v43, %v4410_v27 }
 0x86d   : > { %v3587_v31 = vpack.c.bf16 %v1401_v42, %v1399_v18  ;;  %v1396_v32 = vadd.f32 %v1395_v30, %v4410_v27 }
 0x86e   : > { %v1402_v12 = vmax.f32 %v1394_v34, 0.0 }
 0x86f   : > { %v1403_v35 = vmax.f32 %v1396_v32, 0.0  ;;  %3588 = vmatprep.subr.bf16.mxu1 %v3587_v31  ;;  %v1708_v10 = vpop.f32.mrb[18].mxu0 }
 0x870   : > { %3590 = vmatpush1.bf16.msra.mxu1 %v3589_v28  ;;  %v1710_v23 = vpop.f32.mrb[19].mxu0  ;;  %v1709_v25 = vadd.f32 %v1708_v10, %v4586_v24  ;;  %v4640_v28 = vpop.permute.xlu1 %1833 }
 0x871   : > { %1521 = vmatprep.subr.mxu1 %v1403_v35  ;;  %v1711_v29 = vadd.f32 %v1710_v23, %v4586_v24  ;;  %v4647_v10 = vpop.permute.xlu0 %1838 }
 0x872   : > { %v1808_v39 = vmax.f32 %v1709_v25, 0.0 }
 0x873   : > { %v1714_v36 = vpop.f32.mrb[20].mxu0  ;;  %v1809_v44 = vmax.f32 %v1711_v29, 0.0 }
 0x874   : > { %v1715_v37 = vadd.f32 %v1714_v36, %v4589_v26  ;;  %1522 = vmatpush1.msra.mxu1 %v1402_v12  ;;  %v1716_v27 = vpop.f32.mrb[21].mxu0 }
 0x875   : > { %v1717_v38 = vadd.f32 %v1716_v27, %v4589_v26  ;;  %3394 = vmatmul.mubr.msk.f32.vlgmr.msra.gmra.mrb[42].mxu1 %vm538_vm2, %v4508_v22 }
 0x876   : > { %v1812_v40 = vmax.f32 %v1715_v37, 0.0  ;;  %1587 = vmatprep.mubr.f32.mxu1 %v4080_v6 }
 0x877   : > { %v1813_v46 = vmax.f32 %v1717_v38, 0.0  ;;  %v1720_v45 = vpop.f32.mrb[22].mxu0 }
 0x878   : > { %v3601_v49 = vpack.c.bf16 %v1812_v40, %v1808_v39  ;;  %v1722_v51 = vpop.f32.mrb[23].mxu0  ;;  %v1721_v59 = vadd.f32 %v1720_v45, %v4597_v48 }
 0x879   : > { %v3599_v52 = vpack.c.bf16 %v1813_v46, %v1809_v44  ;;  %v1723_v53 = vadd.f32 %v1722_v51, %v4597_v48  ;;  %3395 = vmatmul.mubr.msk.f32.gmra.mrb[44].mxu1 %vm538_vm2, %v4516_v33  ;;  %v4618_v33 = vld [vmem:[%s5279_s1 + $0xc8] sm:$0xff] }
 0x87a   : > { %1593 = vmatprep.mubr.f32.mxu1 %v4080_v6  ;;  %v1816_v54 = vmax.f32 %v1721_v59, 0.0 }
 0x87b   : > { %v1817_v22 = vmax.f32 %v1723_v53, 0.0  ;;  %3600 = vmatprep.subr.bf16.mxu0 %v3599_v52 }
 0x87c   : > { %3602 = vmatpush1.bf16.msra.mxu0 %v3601_v49 }
 0x87d   : > { %3396 = vmatmul.mubr.msk.f32.gmra.mrb[46].mxu1 %vm538_vm2, %v4524_v41  ;;  %1854 = vmatprep.subr.mxu0 %v1817_v22  ;;  %v4626_v41 = vld [vmem:[%s5279_s1 + $0xd0] sm:$0xff] }
 0x87e   : > { %1789 = vmatprep.mubr.f32.mxu1 %v4080_v6 }
 0x880   : > { %1855 = vmatpush1.msra.mxu0 %v1816_v54 }
 0x881   : > { %3403 = vmatmul.mubr.msk.f32.vlgmr.msra.gmra.mrb[24].mxu0 %vm538_vm2, %v4609_v55 }
 0x882   : > { %1920 = vmatprep.mubr.f32.mxu0 %v4080_v6 }
 0x885   : > { %3404 = vmatmul.mubr.msk.f32.gmra.mrb[26].mxu0 %vm538_vm2, %v4618_v33 }
 0x886   : > { %1926 = vmatprep.mubr.f32.mxu0 %v4080_v6 }
 0x889   : > { %3405 = vmatmul.mubr.msk.f32.gmra.mrb[28].mxu0 %vm538_vm2, %v4626_v41 }
 0x948   : > { %v1583_v56 = vpop.f32.mrb[42].mxu1 }
 0x949   : > { %v1585_v57 = vpop.f32.mrb[43].mxu1  ;;  %v1584_v58 = vadd.f32 %v1583_v56, %v4535_v47 }
 0x94a   : > { %v1586_v60 = vadd.f32 %v1585_v57, %v4535_v47 }
 0x94b   : > { %v1602_v2 = vmax.f32 %v1584_v58, 0.0 }
 0x94c   : > { %v1589_v62 = vpop.f32.mrb[44].mxu1  ;;  %v1603_v3 = vmax.f32 %v1586_v60, 0.0 }
 0x94d   : > { %v1590_v63 = vadd.f32 %v1589_v62, %v4538_v50  ;;  %v1591_v1 = vpop.f32.mrb[45].mxu1 }
 0x94e   : > { %v1592_v0 = vadd.f32 %v1591_v1, %v4538_v50 }
 0x94f   : > { %v1606_v4 = vmax.f32 %v1590_v63, 0.0 }
 0x950   : > { %v1607_v8 = vmax.f32 %v1592_v0, 0.0  ;;  %v1595_v9 = vpop.f32.mrb[46].mxu1 }
 0x951   : > { %v3597_v11 = vpack.c.bf16 %v1606_v4, %v1602_v2  ;;  %v1597_v13 = vpop.f32.mrb[47].mxu1  ;;  %v1596_v15 = vadd.f32 %v1595_v9, %v4546_v61 }
 0x952   : > { %v3595_v17 = vpack.c.bf16 %v1607_v8, %v1603_v3  ;;  %v1598_v14 = vadd.f32 %v1597_v13, %v4546_v61 }
 0x953   : > { %v1610_v42 = vmax.f32 %v1596_v15, 0.0 }
 0x954   : > { %v1611_v47 = vmax.f32 %v1598_v14, 0.0  ;;  %3596 = vmatprep.subr.bf16.mxu1 %v3595_v17  ;;  %v1916_v20 = vpop.f32.mrb[24].mxu0 }
 0x955   : > { %v1917_v21 = vadd.f32 %v1916_v20, %v4636_v19  ;;  %3598 = vmatpush1.bf16.msra.mxu1 %v3597_v11  ;;  %v1918_v50 = vpop.f32.mrb[25].mxu0 }
 0x956   : > { %v1919_v18 = vadd.f32 %v1918_v50, %v4636_v19  ;;  %1729 = vmatprep.subr.mxu1 %v1611_v47 }
 0x957   : > { %v2016_v43 = vmul.f32 0.5, %v1917_v21 }
 0x958   : > { %v2017_v30 = vmul.f32 0.5, %v1919_v18  ;;  %v1922_v31 = vpop.f32.mrb[26].mxu0 }
 0x959   : > { %3839 = vtanh.f32 %v2016_v43  ;;  %v1923_v61 = vadd.f32 %v1922_v31, %v4640_v28  ;;  %1730 = vmatpush1.msra.mxu1 %v1610_v42  ;;  %v1924_v32 = vpop.f32.mrb[27].mxu0 }
 0x95a   : > { %3841 = vtanh.f32 %v2017_v30  ;;  %v1925_v34 = vadd.f32 %v1924_v32, %v4640_v28  ;;  %3400 = vmatmul.mubr.msk.f32.vlgmr.msra.gmra.mrb[48].mxu1 %vm538_vm2, %v4558_v16 }
 0x95b   : > { %v2020_v35 = vmul.f32 0.5, %v1923_v61  ;;  %1795 = vmatprep.mubr.f32.mxu1 %v4080_v6 }
 0x95c   : > { %v2021_v23 = vmul.f32 0.5, %v1925_v34  ;;  %v1928_v12 = vpop.f32.mrb[28].mxu0 }
 0x95d   : > { %3843 = vtanh.f32 %v2020_v35  ;;  %v1929_v25 = vadd.f32 %v1928_v12, %v4647_v10  ;;  %v1930_v29 = vpop.f32.mrb[29].mxu0 }
 0x95e   : > { %3845 = vtanh.f32 %v2021_v23  ;;  %v1931_v36 = vadd.f32 %v1930_v29, %v4647_v10  ;;  %3401 = vmatmul.mubr.msk.f32.gmra.mrb[50].mxu1 %vm538_vm2, %v4567_v5 }
 0x95f   : > { %v2024_v37 = vmul.f32 0.5, %v1929_v25  ;;  %1801 = vmatprep.mubr.f32.mxu1 %v4080_v6 }
 0x960   : > { %v2025_v16 = vmul.f32 0.5, %v1931_v36 }
 0x961   : > { %3847 = vtanh.f32 %v2024_v37 }
 0x962   : > { %3849 = vtanh.f32 %v2025_v16  ;;  %3402 = vmatmul.mubr.msk.f32.gmra.mrb[52].mxu1 %vm538_vm2, %v4575_v7 }
 0x963   : > { %v3840_v27 = vpop.eup %3839  ;;  %1997 = vmatprep.mubr.f32.mxu1 %v4080_v6 }
 0x964   : > { %v3842_v38 = vpop.eup %3841  ;;  %v2040_v39 = vadd.f32 1.0, %v3840_v27 }
 0x965   : > { %v2041_v40 = vadd.f32 1.0, %v3842_v38 }
 0x966   : > { %v2052_v44 = vmul.f32 0.5, %v2040_v39 }
 0x967   : > { %v3844_v46 = vpop.eup %3843  ;;  %v2053_v45 = vmul.f32 0.5, %v2041_v40 }
 0x968   : > { %v3846_v49 = vpop.eup %3845  ;;  %v2044_v5 = vadd.f32 1.0, %v3844_v46  ;;  %2160 = vxpose.xlu0.b32.start [1/3] (short) %v2052_v44, 128 }
 0x969   : > { %v2045_v51 = vadd.f32 1.0, %v3846_v49  ;;  %2192 = vxpose.xlu1.b32.start [1/3] (short) %v2053_v45, 128 }
 0x96a   : > { %v2056_v52 = vmul.f32 0.5, %v2044_v5 }
 0x96b   : > { %v3848_v53 = vpop.eup %3847  ;;  %v2057_v59 = vmul.f32 0.5, %v2045_v51 }
 0x96c   : > { %v3850_v22 = vpop.eup %3849  ;;  %v2048_v54 = vadd.f32 1.0, %v3848_v53  ;;  %2161 = vxpose.xlu0.b32.cont [2/3] (short) %v2056_v52, 128 }
 0x96d   : > { %v2049_v7 = vadd.f32 1.0, %v3850_v22  ;;  %2193 = vxpose.xlu1.b32.cont [2/3] (short) %v2057_v59, 128 }
 0x96e   : > { %v2060_v56 = vmul.f32 0.5, %v2048_v54 }
 0x96f   : > { %v2061_v57 = vmul.f32 0.5, %v2049_v7 }
 0x970   : > { %2162 = vxpose.xlu0.b32.end [3/3] (short) %v2060_v56, 128 }
 0x971   : > { %2194 = vxpose.xlu1.b32.end [3/3] (short) %v2061_v57, 128 }
 0xa2d   : > { %v1791_v58 = vpop.f32.mrb[48].mxu1 }
 0xa2e   : > { %v1793_v60 = vpop.f32.mrb[49].mxu1  ;;  %v1792_v62 = vadd.f32 %v1791_v58, %v4586_v24 }
 0xa2f   : > { %v1794_v63 = vadd.f32 %v1793_v60, %v4586_v24 }
 0xa30   : > { %v1810_v3 = vmax.f32 %v1792_v62, 0.0 }
 0xa31   : > { %v1797_v1 = vpop.f32.mrb[50].mxu1  ;;  %v1811_v9 = vmax.f32 %v1794_v63, 0.0 }
 0xa32   : > { %v1798_v0 = vadd.f32 %v1797_v1, %v4589_v26  ;;  %v1799_v2 = vpop.f32.mrb[51].mxu1 }
 0xa33   : > { %v1800_v4 = vadd.f32 %v1799_v2, %v4589_v26  ;;  %v2112_v26 = vpop.trf.xlu0 }
 0xa34   : > { %v1814_v8 = vmax.f32 %v1798_v0, 0.0  ;;  %2144 = vst.msk [vmem:[%s4675_s12 + $0x80] sm:$0xff] %vm322_vm0, %v2112_v26 }
 0xa35   : > { %v1815_v11 = vmax.f32 %v1800_v4, 0.0  ;;  %v1803_v13 = vpop.f32.mrb[52].mxu1 }
 0xa36   : > { %v3605_v17 = vpack.c.bf16 %v1814_v8, %v1810_v3  ;;  %v1805_v14 = vpop.f32.mrb[53].mxu1  ;;  %v1804_v20 = vadd.f32 %v1803_v13, %v4597_v48 }
 0xa37   : > { %v3603_v15 = vpack.c.bf16 %v1815_v11, %v1811_v9  ;;  %v1806_v47 = vadd.f32 %v1805_v14, %v4597_v48  ;;  %v2080_v48 = vpop.trf.xlu1 }
 0xa38   : > { %v1818_v21 = vmax.f32 %v1804_v20, 0.0  ;;  %2128 = vst.msk [vmem:[%s4675_s12] sm:$0xff] %vm322_vm0, %v2080_v48 }
 0xa39   : > { %v1819_v24 = vmax.f32 %v1806_v47, 0.0  ;;  %3604 = vmatprep.subr.bf16.mxu1 %v3603_v15 }
 0xa3a   : > { %3606 = vmatpush1.bf16.msra.mxu1 %v3605_v17 }
 0xa3b   : > { %1937 = vmatprep.subr.mxu1 %v1819_v24 }
 0xa3e   : > { %1938 = vmatpush1.msra.mxu1 %v1818_v21 }
 0xa3f   : > { %3406 = vmatmul.mubr.msk.f32.vlgmr.msra.gmra.mrb[54].mxu1 %vm538_vm2, %v4609_v55  ;;  %v2081_v55 = vpop.trf.xlu1 }
 0xa40   : > { %2003 = vmatprep.mubr.f32.mxu1 %v4080_v6  ;;  %2129 = vst.msk [vmem:[%s4675_s12 + $0x8] sm:$0xff] %vm322_vm0, %v2081_v55 }
 0xa43   : > { %3407 = vmatmul.mubr.msk.f32.gmra.mrb[56].mxu1 %vm538_vm2, %v4618_v33 }
 0xa44   : > { %2009 = vmatprep.mubr.f32.mxu1 %v4080_v6  ;;  %v2113_v6 = vpop.trf.xlu0 }
 0xa45   : > { %2145 = vst.msk [vmem:[%s4675_s12 + $0x88] sm:$0xff] %vm322_vm0, %v2113_v6 }
 0xa47   : > { %3408 = vmatmul.mubr.msk.f32.gmra.mrb[58].mxu1 %vm538_vm2, %v4626_v41  ;;  %v2082_v41 = vpop.trf.xlu1 }
 0xa48   : > { %v2114_v33 = vpop.trf.xlu0  ;;  %2130 = vst.msk [vmem:[%s4675_s12 + $0x10] sm:$0xff] %vm322_vm0, %v2082_v41 }
 0xa49   : > { %2146 = vst.msk [vmem:[%s4675_s12 + $0x90] sm:$0xff] %vm322_vm0, %v2114_v33 }
 0xa4b   : > { %v2083_v18 = vpop.trf.xlu1 }
 0xa4c   : > { %v2115_v50 = vpop.trf.xlu0  ;;  %2131 = vst.msk [vmem:[%s4675_s12 + $0x18] sm:$0xff] %vm322_vm0, %v2083_v18 }
 0xa4d   : > { %2147 = vst.msk [vmem:[%s4675_s12 + $0x98] sm:$0xff] %vm322_vm0, %v2115_v50 }
 0xa4f   : > { %v2084_v43 = vpop.trf.xlu1 }
 0xa50   : > { %v2116_v42 = vpop.trf.xlu0  ;;  %2132 = vst.msk [vmem:[%s4675_s12 + $0x20] sm:$0xff] %vm322_vm0, %v2084_v43 }
 0xa51   : > { %2148 = vst.msk [vmem:[%s4675_s12 + $0xa0] sm:$0xff] %vm322_vm0, %v2116_v42 }
 0xa53   : > { %v2085_v31 = vpop.trf.xlu1 }
 0xa54   : > { %v2117_v30 = vpop.trf.xlu0  ;;  %2133 = vst.msk [vmem:[%s4675_s12 + $0x28] sm:$0xff] %vm322_vm0, %v2085_v31 }
 0xa55   : > { %2149 = vst.msk [vmem:[%s4675_s12 + $0xa8] sm:$0xff] %vm322_vm0, %v2117_v30 }
 0xa57   : > { %v2086_v32 = vpop.trf.xlu1 }
 0xa58   : > { %v2118_v61 = vpop.trf.xlu0  ;;  %2134 = vst.msk [vmem:[%s4675_s12 + $0x30] sm:$0xff] %vm322_vm0, %v2086_v32 }
 0xa59   : > { %2150 = vst.msk [vmem:[%s4675_s12 + $0xb0] sm:$0xff] %vm322_vm0, %v2118_v61 }
 0xa5b   : > { %v2087_v35 = vpop.trf.xlu1 }
 0xa5c   : > { %v2119_v34 = vpop.trf.xlu0  ;;  %2135 = vst.msk [vmem:[%s4675_s12 + $0x38] sm:$0xff] %vm322_vm0, %v2087_v35 }
 0xa5d   : > { %2151 = vst.msk [vmem:[%s4675_s12 + $0xb8] sm:$0xff] %vm322_vm0, %v2119_v34 }
 0xa5f   : > { %v2088_v12 = vpop.trf.xlu1 }
 0xa60   : > { %v2120_v23 = vpop.trf.xlu0  ;;  %2136 = vst.msk [vmem:[%s4675_s12 + $0x40] sm:$0xff] %vm322_vm0, %v2088_v12 }
 0xa61   : > { %2152 = vst.msk [vmem:[%s4675_s12 + $0xc0] sm:$0xff] %vm322_vm0, %v2120_v23 }
 0xa63   : > { %v2089_v29 = vpop.trf.xlu1 }
 0xa64   : > { %v2121_v25 = vpop.trf.xlu0  ;;  %2137 = vst.msk [vmem:[%s4675_s12 + $0x48] sm:$0xff] %vm322_vm0, %v2089_v29 }
 0xa65   : > { %2153 = vst.msk [vmem:[%s4675_s12 + $0xc8] sm:$0xff] %vm322_vm0, %v2121_v25 }
 0xa67   : > { %v2090_v37 = vpop.trf.xlu1 }
 0xa68   : > { %v2122_v36 = vpop.trf.xlu0  ;;  %2138 = vst.msk [vmem:[%s4675_s12 + $0x50] sm:$0xff] %vm322_vm0, %v2090_v37 }
 0xa69   : > { %2154 = vst.msk [vmem:[%s4675_s12 + $0xd0] sm:$0xff] %vm322_vm0, %v2122_v36 }
 0xa6b   : > { %v2091_v27 = vpop.trf.xlu1 }
 0xa6c   : > { %v2123_v16 = vpop.trf.xlu0  ;;  %2139 = vst.msk [vmem:[%s4675_s12 + $0x58] sm:$0xff] %vm322_vm0, %v2091_v27 }
 0xa6d   : > { %2155 = vst.msk [vmem:[%s4675_s12 + $0xd8] sm:$0xff] %vm322_vm0, %v2123_v16 }
 0xa6f   : > { %v2092_v39 = vpop.trf.xlu1 }
 0xa70   : > { %v2124_v38 = vpop.trf.xlu0  ;;  %2140 = vst.msk [vmem:[%s4675_s12 + $0x60] sm:$0xff] %vm322_vm0, %v2092_v39 }
 0xa71   : > { %2156 = vst.msk [vmem:[%s4675_s12 + $0xe0] sm:$0xff] %vm322_vm0, %v2124_v38 }
 0xa73   : > { %v2093_v44 = vpop.trf.xlu1 }
 0xa74   : > { %v2125_v40 = vpop.trf.xlu0  ;;  %2141 = vst.msk [vmem:[%s4675_s12 + $0x68] sm:$0xff] %vm322_vm0, %v2093_v44 }
 0xa75   : > { %2157 = vst.msk [vmem:[%s4675_s12 + $0xe8] sm:$0xff] %vm322_vm0, %v2125_v40 }
 0xa77   : > { %v2094_v45 = vpop.trf.xlu1 }
 0xa78   : > { %v2126_v46 = vpop.trf.xlu0  ;;  %2142 = vst.msk [vmem:[%s4675_s12 + $0x70] sm:$0xff] %vm322_vm0, %v2094_v45 }
 0xa79   : > { %2158 = vst.msk [vmem:[%s4675_s12 + $0xf0] sm:$0xff] %vm322_vm0, %v2126_v46 }
 0xa7b   : > { %v2095_v5 = vpop.trf.xlu1 }
 0xa7c   : > { %v2127_v49 = vpop.trf.xlu0  ;;  %2143 = vst.msk [vmem:[%s4675_s12 + $0x78] sm:$0xff] %vm322_vm0, %v2095_v5 }
 0xa7d   : > { %2159 = vst.msk [vmem:[%s4675_s12 + $0xf8] sm:$0xff] %vm322_vm0, %v2127_v49 }
 0xa7f   : > { %v2208_v51 = vpop.trf.xlu1 }
 0xa80   : > { %v2176_v52 = vpop.trf.xlu0  ;;  %2240 = vst.msk [vmem:[%s4742_s18 + $0x80] sm:$0xff] %vm322_vm0, %v2208_v51 }
 0xa81   : > { %2224 = vst.msk [vmem:[%s4742_s18] sm:$0xff] %vm322_vm0, %v2176_v52 }
 0xa83   : > { %v2209_v53 = vpop.trf.xlu1 }
 0xa84   : > { %v2177_v59 = vpop.trf.xlu0  ;;  %2241 = vst.msk [vmem:[%s4742_s18 + $0x88] sm:$0xff] %vm322_vm0, %v2209_v53 }
 0xa85   : > { %2225 = vst.msk [vmem:[%s4742_s18 + $0x8] sm:$0xff] %vm322_vm0, %v2177_v59 }
 0xa87   : > { %v2210_v22 = vpop.trf.xlu1 }
 0xa88   : > { %v2178_v54 = vpop.trf.xlu0  ;;  %2242 = vst.msk [vmem:[%s4742_s18 + $0x90] sm:$0xff] %vm322_vm0, %v2210_v22 }
 0xa89   : > { %2226 = vst.msk [vmem:[%s4742_s18 + $0x10] sm:$0xff] %vm322_vm0, %v2178_v54 }
 0xa8b   : > { %v2211_v7 = vpop.trf.xlu1 }
 0xa8c   : > { %v2179_v56 = vpop.trf.xlu0  ;;  %2243 = vst.msk [vmem:[%s4742_s18 + $0x98] sm:$0xff] %vm322_vm0, %v2211_v7 }
 0xa8d   : > { %2227 = vst.msk [vmem:[%s4742_s18 + $0x18] sm:$0xff] %vm322_vm0, %v2179_v56 }
 0xa8f   : > { %v2212_v57 = vpop.trf.xlu1 }
 0xa90   : > { %v2180_v58 = vpop.trf.xlu0  ;;  %2244 = vst.msk [vmem:[%s4742_s18 + $0xa0] sm:$0xff] %vm322_vm0, %v2212_v57 }
 0xa91   : > { %2228 = vst.msk [vmem:[%s4742_s18 + $0x20] sm:$0xff] %vm322_vm0, %v2180_v58 }
 0xa93   : > { %v2213_v60 = vpop.trf.xlu1 }
 0xa94   : > { %v2181_v62 = vpop.trf.xlu0  ;;  %2245 = vst.msk [vmem:[%s4742_s18 + $0xa8] sm:$0xff] %vm322_vm0, %v2213_v60 }
 0xa95   : > { %2229 = vst.msk [vmem:[%s4742_s18 + $0x28] sm:$0xff] %vm322_vm0, %v2181_v62 }
 0xa97   : > { %v2214_v63 = vpop.trf.xlu1 }
 0xa98   : > { %v2182_v1 = vpop.trf.xlu0  ;;  %2246 = vst.msk [vmem:[%s4742_s18 + $0xb0] sm:$0xff] %vm322_vm0, %v2214_v63 }
 0xa99   : > { %2230 = vst.msk [vmem:[%s4742_s18 + $0x30] sm:$0xff] %vm322_vm0, %v2182_v1 }
 0xa9b   : > { %v2215_v0 = vpop.trf.xlu1 }
 0xa9c   : > { %v2183_v2 = vpop.trf.xlu0  ;;  %2247 = vst.msk [vmem:[%s4742_s18 + $0xb8] sm:$0xff] %vm322_vm0, %v2215_v0 }
 0xa9d   : > { %2231 = vst.msk [vmem:[%s4742_s18 + $0x38] sm:$0xff] %vm322_vm0, %v2183_v2 }
 0xa9f   : > { %v2216_v4 = vpop.trf.xlu1 }
 0xaa0   : > { %v2184_v3 = vpop.trf.xlu0  ;;  %2248 = vst.msk [vmem:[%s4742_s18 + $0xc0] sm:$0xff] %vm322_vm0, %v2216_v4 }
 0xaa1   : > { %2232 = vst.msk [vmem:[%s4742_s18 + $0x40] sm:$0xff] %vm322_vm0, %v2184_v3 }
 0xaa3   : > { %v2217_v8 = vpop.trf.xlu1 }
 0xaa4   : > { %v2185_v9 = vpop.trf.xlu0  ;;  %2249 = vst.msk [vmem:[%s4742_s18 + $0xc8] sm:$0xff] %vm322_vm0, %v2217_v8 }
 0xaa5   : > { %2233 = vst.msk [vmem:[%s4742_s18 + $0x48] sm:$0xff] %vm322_vm0, %v2185_v9 }
 0xaa7   : > { %v2218_v11 = vpop.trf.xlu1 }
 0xaa8   : > { %v2186_v13 = vpop.trf.xlu0  ;;  %2250 = vst.msk [vmem:[%s4742_s18 + $0xd0] sm:$0xff] %vm322_vm0, %v2218_v11 }
 0xaa9   : > { %2234 = vst.msk [vmem:[%s4742_s18 + $0x50] sm:$0xff] %vm322_vm0, %v2186_v13 }
 0xaab   : > { %v2219_v47 = vpop.trf.xlu1 }
 0xaac   : > { %2251 = vst.msk [vmem:[%s4742_s18 + $0xd8] sm:$0xff] %vm322_vm0, %v2219_v47  ;;  %v2187_v24 = vpop.trf.xlu0 }
 0xaad   : > { %2235 = vst.msk [vmem:[%s4742_s18 + $0x58] sm:$0xff] %vm322_vm0, %v2187_v24 }
 0xaaf   : > { %v2220_v33 = vpop.trf.xlu1 }
 0xab0   : > { %2252 = vst.msk [vmem:[%s4742_s18 + $0xe0] sm:$0xff] %vm322_vm0, %v2220_v33 }
 0xab3   : > { %v2221_v31 = vpop.trf.xlu1 }
 0xab4   : > { %2253 = vst.msk [vmem:[%s4742_s18 + $0xe8] sm:$0xff] %vm322_vm0, %v2221_v31 }
 0xab7   : > { %v2222_v35 = vpop.trf.xlu1 }
 0xab8   : > { %2254 = vst.msk [vmem:[%s4742_s18 + $0xf0] sm:$0xff] %vm322_vm0, %v2222_v35 }
 0xabb   : > { %v2223_v36 = vpop.trf.xlu1 }
 0xabc   : > { %2255 = vst.msk [vmem:[%s4742_s18 + $0xf8] sm:$0xff] %vm322_vm0, %v2223_v36 }
 0xb12   : > { %v1999_v17 = vpop.f32.mrb[54].mxu1 }
 0xb13   : > { %v2000_v14 = vadd.f32 %v1999_v17, %v4636_v19  ;;  %v2001_v15 = vpop.f32.mrb[55].mxu1 }
 0xb14   : > { %v2002_v20 = vadd.f32 %v2001_v15, %v4636_v19  ;;  %v2188_v19 = vpop.trf.xlu0 }
 0xb15   : > { %v2018_v21 = vmul.f32 0.5, %v2000_v14  ;;  %2236 = vst.msk [vmem:[%s4742_s18 + $0x60] sm:$0xff] %vm322_vm0, %v2188_v19 }
 0xb16   : > { %v2019_v26 = vmul.f32 0.5, %v2002_v20  ;;  %v2005_v48 = vpop.f32.mrb[56].mxu1 }
 0xb17   : > { %3851 = vtanh.f32 %v2018_v21  ;;  %v2006_v6 = vadd.f32 %v2005_v48, %v4640_v28  ;;  %v2007_v55 = vpop.f32.mrb[57].mxu1 }
 0xb18   : > { %3853 = vtanh.f32 %v2019_v26  ;;  %v2008_v41 = vadd.f32 %v2007_v55, %v4640_v28  ;;  %v2189_v28 = vpop.trf.xlu0 }
 0xb19   : > { %v2022_v50 = vmul.f32 0.5, %v2006_v6  ;;  %2237 = vst.msk [vmem:[%s4742_s18 + $0x68] sm:$0xff] %vm322_vm0, %v2189_v28 }
 0xb1a   : > { %v2023_v18 = vmul.f32 0.5, %v2008_v41  ;;  %v2011_v42 = vpop.f32.mrb[58].mxu1 }
 0xb1b   : > { %3855 = vtanh.f32 %v2022_v50  ;;  %v2012_v43 = vadd.f32 %v2011_v42, %v4647_v10  ;;  %v2013_v30 = vpop.f32.mrb[59].mxu1 }
 0xb1c   : > { %3857 = vtanh.f32 %v2023_v18  ;;  %v2014_v61 = vadd.f32 %v2013_v30, %v4647_v10  ;;  %v2190_v23 = vpop.trf.xlu0 }
 0xb1d   : > { %v2026_v32 = vmul.f32 0.5, %v2012_v43  ;;  %2238 = vst.msk [vmem:[%s4742_s18 + $0x70] sm:$0xff] %vm322_vm0, %v2190_v23 }
 0xb1e   : > { %v2027_v34 = vmul.f32 0.5, %v2014_v61 }
 0xb1f   : > { %3859 = vtanh.f32 %v2026_v32 }
 0xb20   : > { %3861 = vtanh.f32 %v2027_v34  ;;  %v2191_v16 = vpop.trf.xlu0 }
 0xb21   : > { %v3852_v12 = vpop.eup %3851  ;;  %2239 = vst.msk [vmem:[%s4742_s18 + $0x78] sm:$0xff] %vm322_vm0, %v2191_v16 }
 0xb22   : > { %v3854_v25 = vpop.eup %3853  ;;  %v2042_v10 = vadd.f32 1.0, %v3852_v12 }
 0xb23   : > { %v2043_v29 = vadd.f32 1.0, %v3854_v25 }
 0xb24   : > { %v2054_v37 = vmul.f32 0.5, %v2042_v10 }
 0xb25   : > { %v3856_v27 = vpop.eup %3855  ;;  %v2055_v38 = vmul.f32 0.5, %v2043_v29 }
 0xb26   : > { %v3858_v39 = vpop.eup %3857  ;;  %v2046_v40 = vadd.f32 1.0, %v3856_v27  ;;  %2256 = vxpose.xlu0.b32.start [1/3] (short) %v2054_v37, 128 }
 0xb27   : > { %v2047_v44 = vadd.f32 1.0, %v3858_v39  ;;  %2288 = vxpose.xlu1.b32.start [1/3] (short) %v2055_v38, 128 }
 0xb28   : > { %v2058_v46 = vmul.f32 0.5, %v2046_v40 }
 0xb29   : > { %v3860_v45 = vpop.eup %3859  ;;  %v2059_v49 = vmul.f32 0.5, %v2047_v44 }
 0xb2a   : > { %v3862_v5 = vpop.eup %3861  ;;  %v2050_v51 = vadd.f32 1.0, %v3860_v45  ;;  %2257 = vxpose.xlu0.b32.cont [2/3] (short) %v2058_v46, 128 }
 0xb2b   : > { %v2051_v52 = vadd.f32 1.0, %v3862_v5  ;;  %2289 = vxpose.xlu1.b32.cont [2/3] (short) %v2059_v49, 128 }
 0xb2c   : > { %v2062_v53 = vmul.f32 0.5, %v2050_v51 }
 0xb2d   : > { %v2063_v59 = vmul.f32 0.5, %v2051_v52 }
 0xb2e   : > { %2258 = vxpose.xlu0.b32.end [3/3] (short) %v2062_v53, 128 }
 0xb2f   : > { %2290 = vxpose.xlu1.b32.end [3/3] (short) %v2063_v59, 128 }
 0xba6   : > { %v2272_v22 = vpop.trf.xlu0 }
 0xba7   : > { %v2304_v54 = vpop.trf.xlu1  ;;  %2320 = vst.msk [vmem:[%s4815_s13] sm:$0xff] %vm322_vm0, %v2272_v22 }
 0xba8   : > { %2336 = vst.msk [vmem:[%s4815_s13 + $0x80] sm:$0xff] %vm322_vm0, %v2304_v54 }
 0xbaa   : > { %v2273_v7 = vpop.trf.xlu0 }
 0xbab   : > { %v2305_v56 = vpop.trf.xlu1  ;;  %2321 = vst.msk [vmem:[%s4815_s13 + $0x8] sm:$0xff] %vm322_vm0, %v2273_v7 }
 0xbac   : > { %2337 = vst.msk [vmem:[%s4815_s13 + $0x88] sm:$0xff] %vm322_vm0, %v2305_v56 }
 0xbae   : > { %v2274_v57 = vpop.trf.xlu0 }
 0xbaf   : > { %v2306_v58 = vpop.trf.xlu1  ;;  %2322 = vst.msk [vmem:[%s4815_s13 + $0x10] sm:$0xff] %vm322_vm0, %v2274_v57 }
 0xbb0   : > { %2338 = vst.msk [vmem:[%s4815_s13 + $0x90] sm:$0xff] %vm322_vm0, %v2306_v58 }
 0xbb2   : > { %v2275_v60 = vpop.trf.xlu0 }
 0xbb3   : > { %v2307_v62 = vpop.trf.xlu1  ;;  %2323 = vst.msk [vmem:[%s4815_s13 + $0x18] sm:$0xff] %vm322_vm0, %v2275_v60 }
 0xbb4   : > { %2339 = vst.msk [vmem:[%s4815_s13 + $0x98] sm:$0xff] %vm322_vm0, %v2307_v62 }
 0xbb6   : > { %v2276_v63 = vpop.trf.xlu0 }
 0xbb7   : > { %v2308_v1 = vpop.trf.xlu1  ;;  %2324 = vst.msk [vmem:[%s4815_s13 + $0x20] sm:$0xff] %vm322_vm0, %v2276_v63 }
 0xbb8   : > { %2340 = vst.msk [vmem:[%s4815_s13 + $0xa0] sm:$0xff] %vm322_vm0, %v2308_v1 }
 0xbba   : > { %v2277_v0 = vpop.trf.xlu0 }
 0xbbb   : > { %v2309_v2 = vpop.trf.xlu1  ;;  %2325 = vst.msk [vmem:[%s4815_s13 + $0x28] sm:$0xff] %vm322_vm0, %v2277_v0 }
 0xbbc   : > { %2341 = vst.msk [vmem:[%s4815_s13 + $0xa8] sm:$0xff] %vm322_vm0, %v2309_v2 }
 0xbbe   : > { %v2278_v4 = vpop.trf.xlu0 }
 0xbbf   : > { %v2310_v3 = vpop.trf.xlu1  ;;  %2326 = vst.msk [vmem:[%s4815_s13 + $0x30] sm:$0xff] %vm322_vm0, %v2278_v4 }
 0xbc0   : > { %2342 = vst.msk [vmem:[%s4815_s13 + $0xb0] sm:$0xff] %vm322_vm0, %v2310_v3 }
 0xbc2   : > { %v2279_v8 = vpop.trf.xlu0 }
 0xbc3   : > { %v2311_v9 = vpop.trf.xlu1  ;;  %2327 = vst.msk [vmem:[%s4815_s13 + $0x38] sm:$0xff] %vm322_vm0, %v2279_v8 }
 0xbc4   : > { %2343 = vst.msk [vmem:[%s4815_s13 + $0xb8] sm:$0xff] %vm322_vm0, %v2311_v9 }
 0xbc6   : > { %v2280_v11 = vpop.trf.xlu0 }
 0xbc7   : > { %v2312_v13 = vpop.trf.xlu1  ;;  %2328 = vst.msk [vmem:[%s4815_s13 + $0x40] sm:$0xff] %vm322_vm0, %v2280_v11 }
 0xbc8   : > { %2344 = vst.msk [vmem:[%s4815_s13 + $0xc0] sm:$0xff] %vm322_vm0, %v2312_v13 }
 0xbca   : > { %v2281_v17 = vpop.trf.xlu0 }
 0xbcb   : > { %v2313_v14 = vpop.trf.xlu1  ;;  %2329 = vst.msk [vmem:[%s4815_s13 + $0x48] sm:$0xff] %vm322_vm0, %v2281_v17 }
 0xbcc   : > { %2345 = vst.msk [vmem:[%s4815_s13 + $0xc8] sm:$0xff] %vm322_vm0, %v2313_v14 }
 0xbce   : > { %v2282_v15 = vpop.trf.xlu0 }
 0xbcf   : > { %v2314_v47 = vpop.trf.xlu1  ;;  %2330 = vst.msk [vmem:[%s4815_s13 + $0x50] sm:$0xff] %vm322_vm0, %v2282_v15 }
 0xbd0   : > { %2346 = vst.msk [vmem:[%s4815_s13 + $0xd0] sm:$0xff] %vm322_vm0, %v2314_v47 }
 0xbd2   : > { %v2283_v20 = vpop.trf.xlu0 }
 0xbd3   : > { %v2315_v24 = vpop.trf.xlu1  ;;  %2331 = vst.msk [vmem:[%s4815_s13 + $0x58] sm:$0xff] %vm322_vm0, %v2283_v20 }
 0xbd4   : > { %2347 = vst.msk [vmem:[%s4815_s13 + $0xd8] sm:$0xff] %vm322_vm0, %v2315_v24 }
 0xbd6   : > { %v2284_v21 = vpop.trf.xlu0 }
 0xbd7   : > { %v2316_v26 = vpop.trf.xlu1  ;;  %2332 = vst.msk [vmem:[%s4815_s13 + $0x60] sm:$0xff] %vm322_vm0, %v2284_v21 }
 0xbd8   : > { %2348 = vst.msk [vmem:[%s4815_s13 + $0xe0] sm:$0xff] %vm322_vm0, %v2316_v26 }
 0xbda   : > { %v2285_v48 = vpop.trf.xlu0 }
 0xbdb   : > { %v2317_v6 = vpop.trf.xlu1  ;;  %2333 = vst.msk [vmem:[%s4815_s13 + $0x68] sm:$0xff] %vm322_vm0, %v2285_v48 }
 0xbdc   : > { %2349 = vst.msk [vmem:[%s4815_s13 + $0xe8] sm:$0xff] %vm322_vm0, %v2317_v6 }
 0xbde   : > { %v2286_v55 = vpop.trf.xlu0  ;;  %2366 = sbr.rel (!%p4136_p4) target bundleno = 3101 (0xc1d), region = 36 }
 0xbdf   : > { %v2318_v33 = vpop.trf.xlu1  ;;  %2334 = vst.msk [vmem:[%s4815_s13 + $0x70] sm:$0xff] %vm322_vm0, %v2286_v55 }
 0xbe0   : > { %2350 = vst.msk [vmem:[%s4815_s13 + $0xf0] sm:$0xff] %vm322_vm0, %v2318_v33 }
 0xbe2   : > { %v2287_v41 = vpop.trf.xlu0 }
 0xbe3   : > { %v2319_v19 = vpop.trf.xlu1  ;;  %2335 = vst.msk [vmem:[%s4815_s13 + $0x78] sm:$0xff] %vm322_vm0, %v2287_v41 }
 0xbe4   : > { %2351 = vst.msk [vmem:[%s4815_s13 + $0xf8] sm:$0xff] %vm322_vm0, %v2319_v19 }
 0xbe5   : > { %s5306_s14 = smov (!%p2369_p8, %s2368_s14), 32 }
 0xbe6   : > { %s3413_s23 = sshll.u32 %s5306_s14, 7 }
 0xbe7   : > { %p3416_p9 = scmp.eq.s32.totalorder %s3413_s23, 0 }
 0xbe8   : > { %s4894_s24 = sshrl.u32 (!%p3416_p9), %s5306_s14, 5 }
 0xbe9   : > { %2377 = sbr.rel (%p3416_p9) target bundleno = 3101 (0xc1d), region = 40  ;;  %p3417_p10 = scmp.le.s32.totalorder (!%p3416_p9), %s4894_s24, 0 }
 0xbf0   : > { %3205 = sbr.rel (%p3417_p10) target bundleno = 3080 (0xc08), region = 260  ;;  %s5287_s28 = smov (!%p3417_p10), %s4888_s20 }
 0xbf1   : > { %s5288_s29 = smov (!%p3417_p10), %s4675_s12  ;;  %s4903_s30 = smov (!%p3417_p10), 0  }
 0xbf2   : > { %s4905_s6 = smov (!%p3417_p10), 0  }
 0xbf7 LB: >> { %v2501_v50 = vld [vmem:[%s3989_s29] sm:$0xff]  ;;  %v2503_v18 = vld [vmem:[%s3989_s29 + $0x8] sm:$0xff]  ;;  %v2505_v42 = vld [vmem:[%s3989_s29 + $0x10] sm:$0xff]  ;;  %s2565_s7 = sadd.s32 1, %s3993_s30  ;;  %s2495_s6 = sadd.s32 1, %s3997_s6   ;;  %s3997_s6 = sphi %s4905_s6, %s2495_s6   ;;  %s3993_s30 = sphi %s4903_s30, %s5291_s30   ;;  %s3989_s29 = sphi %s5288_s29, %s5290_s29   ;;  %s3985_s28 = sphi %s5287_s28, %s5289_s28  }
 0xbf8   : >> { %2502 = vst [vmem:[%s3985_s28] sm:$0xff] %v2501_v50  ;;  %2504 = vst [vmem:[%s3985_s28 + $0x8] sm:$0xff] %v2503_v18  ;;  %v2507_v43 = vld [vmem:[%s3989_s29 + $0x18] sm:$0xff]  ;;  %v2509_v30 = vld [vmem:[%s3989_s29 + $0x20] sm:$0xff]  ;;  %p2566_p11 = scmp.ge.s32.totalorder %s2565_s7, %s4894_s24  ;;  %p2494_p12 = scmp.ge.s32.totalorder %s2495_s6, %s4894_s24 }
 0xbf9   : >> { %2506 = vst [vmem:[%s3985_s28 + $0x10] sm:$0xff] %v2505_v42  ;;  %v2511_v31 = vld [vmem:[%s3989_s29 + $0x28] sm:$0xff]  ;;  %2508 = vst [vmem:[%s3985_s28 + $0x18] sm:$0xff] %v2507_v43  ;;  %v2513_v61 = vld [vmem:[%s3989_s29 + $0x30] sm:$0xff] }
 0xbfa   : >> { %2510 = vst [vmem:[%s3985_s28 + $0x20] sm:$0xff] %v2509_v30  ;;  %2512 = vst [vmem:[%s3985_s28 + $0x28] sm:$0xff] %v2511_v31  ;;  %v2515_v28 = vld [vmem:[%s3989_s29 + $0x38] sm:$0xff]  ;;  %v2517_v32 = vld [vmem:[%s3989_s29 + $0x40] sm:$0xff]  ;;  %s5308_s7 = smov (%p2566_p11, %s2565_s7), 0 }
 0xbfb   : >> { %2514 = vst [vmem:[%s3985_s28 + $0x30] sm:$0xff] %v2513_v61  ;;  %2516 = vst [vmem:[%s3985_s28 + $0x38] sm:$0xff] %v2515_v28  ;;  %v2519_v34 = vld [vmem:[%s3989_s29 + $0x48] sm:$0xff]  ;;  %v2521_v35 = vld [vmem:[%s3989_s29 + $0x50] sm:$0xff]  ;;  %s3418_s8 = sshll.u32 %s5308_s7, 8  ;;  %s5291_s30 = smov %s5308_s7 }
 0xbfc   : >> { %2518 = vst [vmem:[%s3985_s28 + $0x40] sm:$0xff] %v2517_v32  ;;  %v2523_v23 = vld [vmem:[%s3989_s29 + $0x58] sm:$0xff]  ;;  %2520 = vst [vmem:[%s3985_s28 + $0x48] sm:$0xff] %v2519_v34  ;;  %v2525_v12 = vld [vmem:[%s3989_s29 + $0x60] sm:$0xff]  ;;  %s4961_s9 = scalar_lea.vmem %s4675_s12, %s3418_s8 [#allocation2]   ;;  %s2571_s10 = scalar_lea.vmem %s4888_s20, %s3418_s8  }
 0xbfd   : >> { %2522 = vst [vmem:[%s3985_s28 + $0x50] sm:$0xff] %v2521_v35  ;;  %2524 = vst [vmem:[%s3985_s28 + $0x58] sm:$0xff] %v2523_v23  ;;  %v2527_v25 = vld [vmem:[%s3989_s29 + $0x68] sm:$0xff]  ;;  %v2529_v10 = vld [vmem:[%s3989_s29 + $0x70] sm:$0xff] }
 0xbfe   : >> { %2526 = vst [vmem:[%s3985_s28 + $0x60] sm:$0xff] %v2525_v12  ;;  %2528 = vst [vmem:[%s3985_s28 + $0x68] sm:$0xff] %v2527_v25  ;;  %v2531_v29 = vld [vmem:[%s3989_s29 + $0x78] sm:$0xff]  ;;  %v2533_v36 = vld [vmem:[%s3989_s29 + $0x80] sm:$0xff] }
 0xbff   : >> { %2530 = vst [vmem:[%s3985_s28 + $0x70] sm:$0xff] %v2529_v10  ;;  %v2535_v37 = vld [vmem:[%s3989_s29 + $0x88] sm:$0xff]  ;;  %2532 = vst [vmem:[%s3985_s28 + $0x78] sm:$0xff] %v2531_v29  ;;  %v2537_v16 = vld [vmem:[%s3989_s29 + $0x90] sm:$0xff] }
 0xc00   : >> { %2534 = vst [vmem:[%s3985_s28 + $0x80] sm:$0xff] %v2533_v36  ;;  %2536 = vst [vmem:[%s3985_s28 + $0x88] sm:$0xff] %v2535_v37  ;;  %v2539_v27 = vld [vmem:[%s3989_s29 + $0x98] sm:$0xff]  ;;  %v2541_v38 = vld [vmem:[%s3989_s29 + $0xa0] sm:$0xff] }
 0xc01   : >> { %2538 = vst [vmem:[%s3985_s28 + $0x90] sm:$0xff] %v2537_v16  ;;  %2540 = vst [vmem:[%s3985_s28 + $0x98] sm:$0xff] %v2539_v27  ;;  %v2543_v39 = vld [vmem:[%s3989_s29 + $0xa8] sm:$0xff]  ;;  %v2545_v40 = vld [vmem:[%s3989_s29 + $0xb0] sm:$0xff]  ;;  %2497 = sbr.rel (!%p2494_p12) target bundleno = 3063 (0xbf7), region = 266 }
 0xc02   : >> { %2542 = vst [vmem:[%s3985_s28 + $0xa0] sm:$0xff] %v2541_v38  ;;  %v2547_v44 = vld [vmem:[%s3989_s29 + $0xb8] sm:$0xff]  ;;  %2544 = vst [vmem:[%s3985_s28 + $0xa8] sm:$0xff] %v2543_v39  ;;  %v2549_v46 = vld [vmem:[%s3989_s29 + $0xc0] sm:$0xff] }
 0xc03   : >> { %2546 = vst [vmem:[%s3985_s28 + $0xb0] sm:$0xff] %v2545_v40  ;;  %2548 = vst [vmem:[%s3985_s28 + $0xb8] sm:$0xff] %v2547_v44  ;;  %v2551_v45 = vld [vmem:[%s3989_s29 + $0xc8] sm:$0xff]  ;;  %v2553_v49 = vld [vmem:[%s3989_s29 + $0xd0] sm:$0xff] }
 0xc04   : >> { %2550 = vst [vmem:[%s3985_s28 + $0xc0] sm:$0xff] %v2549_v46  ;;  %2552 = vst [vmem:[%s3985_s28 + $0xc8] sm:$0xff] %v2551_v45  ;;  %v2555_v5 = vld [vmem:[%s3989_s29 + $0xd8] sm:$0xff]  ;;  %v2557_v51 = vld [vmem:[%s3989_s29 + $0xe0] sm:$0xff] }
 0xc05   : >> { %2554 = vst [vmem:[%s3985_s28 + $0xd0] sm:$0xff] %v2553_v49  ;;  %v2559_v52 = vld [vmem:[%s3989_s29 + $0xe8] sm:$0xff]  ;;  %2556 = vst [vmem:[%s3985_s28 + $0xd8] sm:$0xff] %v2555_v5  ;;  %v2561_v53 = vld [vmem:[%s3989_s29 + $0xf0] sm:$0xff] }
 0xc06   : >> { %2558 = vst [vmem:[%s3985_s28 + $0xe0] sm:$0xff] %v2557_v51  ;;  %2560 = vst [vmem:[%s3985_s28 + $0xe8] sm:$0xff] %v2559_v52  ;;  %v2563_v59 = vld [vmem:[%s3989_s29 + $0xf8] sm:$0xff]  ;;  %s5290_s29 = smov %s4961_s9 }
 0xc07   : >> { %2562 = vst [vmem:[%s3985_s28 + $0xf0] sm:$0xff] %v2561_v53  ;;  %2564 = vst [vmem:[%s3985_s28 + $0xf8] sm:$0xff] %v2563_v59  ;;  %s5289_s28 = smov %s2571_s10 }
 0xc08 PF: > { %s5002_s11 = sand.u32 31, %s5306_s14   ;;  %s3457_s15 = sshll.u32 %s4894_s24, 8 }
 0xc09   : > { %s2576_s17 = scalar_lea.vmem %s4675_s12, %s3457_s15 [#allocation2]   ;;  %s2578_s16 = scalar_lea.vmem %s4888_s20, %s3457_s15  }
 0xc0a   : > { %p3423_p13 = scmp.le.s32.totalorder %s5002_s11, 0 }
 0xc0b   : > { %s3999_s23 = smov (!%p3423_p13), %s2578_s16   ;;  %s4003_s8 = smov (!%p3423_p13), %s2576_s17  }
 0xc0c   : > { %3219 = sbr.rel (%p3423_p13) target bundleno = 3101 (0xc1d), region = 271  ;;  %s4007_s9 = smov (!%p3423_p13), 0  }
 0xc0d   : > { %s4011_s7 = smov (!%p3423_p13), 0  }
 0xc13 LB: >> { %v2588_v22 = vld [vmem:[%s4005_s8] sm:$0xff]  ;;  %s2590_s14 = sadd.s32 1, %s4009_s9  ;;  %s2582_s7 = sadd.s32 1, %s4013_s7   ;;  %s4013_s7 = sphi %s4011_s7, %s2582_s7   ;;  %s4009_s9 = sphi %s4007_s9, %s4008_s9   ;;  %s4005_s8 = sphi %s4003_s8, %s2595_s8   ;;  %s4001_s23 = sphi %s3999_s23, %s2596_s23  }
 0xc14   : >> { %2589 = vst [vmem:[%s4001_s23] sm:$0xff] %v2588_v22  ;;  %p2591_p0 = scmp.ge.s32.totalorder %s2590_s14, %s5002_s11  ;;  %p2581_p1 = scmp.ge.s32.totalorder %s2582_s7, %s5002_s11 }
 0xc16   : >> { %s5310_s14 = smov (%p2591_p0, %s2590_s14), 0  ;;  %2584 = sbr.rel (!%p2581_p1) target bundleno = 3091 (0xc13), region = 277 }
 0xc17   : >> { %s3424_s12 = sshll.u32 %s5310_s14, 3  ;;  %s4008_s9 = smov %s5310_s14  }
 0xc18   : >> { %s2595_s8 = scalar_lea.vmem %s2576_s17, %s3424_s12 [#allocation2]   ;;  %s2596_s23 = scalar_lea.vmem %s2578_s16, %s3424_s12  }
 0xc1d PF: > { %2602 = sbr.rel (!%p4136_p4) target bundleno = 3164 (0xc5c), region = 88  ;;  %s2604_s20 = ssub.s32 (%p4136_p4), 38, %s4141_s27 }
 0xc1e   : > { %s3459_s24 = sshll.u32 (%p4136_p4), %s4124_s21, 8  ;;  %p2605_p2 = scmp.lt.s32.totalorder (%p4136_p4), %s2604_s20, 32 }
 0xc1f   : > { %s5017_s30 = scalar_lea.vmem (%p4136_p4), %s5282_s4, %s3459_s24  }
 0xc24   : > { %s5312_s20 = smov (!%p2605_p2, %s2604_s20), 32 }
 0xc25   : > { %s3427_s6 = sshll.u32 %s5312_s20, 7 }
 0xc26   : > { %p3430_p3 = scmp.eq.s32.totalorder %s3427_s6, 0 }
 0xc27   : > { %s5023_s10 = sshrl.u32 (!%p3430_p3), %s5312_s20, 5 }
 0xc28   : > { %2613 = sbr.rel (%p3430_p3) target bundleno = 3164 (0xc5c), region = 92  ;;  %p3431_p5 = scmp.le.s32.totalorder (!%p3430_p3), %s5023_s10, 0 }
 0xc2f   : > { %3233 = sbr.rel (%p3431_p5) target bundleno = 3143 (0xc47), region = 282  ;;  %s5292_s11 = smov (!%p3431_p5), %s5017_s30 }
 0xc30   : > { %s5293_s15 = smov (!%p3431_p5), %s4742_s18  ;;  %s5032_s17 = smov (!%p3431_p5), 0  }
 0xc31   : > { %s5034_s16 = smov (!%p3431_p5), 0  }
 0xc36 LB: >> { %v2737_v54 = vld [vmem:[%s4021_s15] sm:$0xff]  ;;  %v2739_v7 = vld [vmem:[%s4021_s15 + $0x8] sm:$0xff]  ;;  %v2741_v56 = vld [vmem:[%s4021_s15 + $0x10] sm:$0xff]  ;;  %s2801_s23 = sadd.s32 1, %s4025_s17  ;;  %s2731_s16 = sadd.s32 1, %s4029_s16   ;;  %s4029_s16 = sphi %s5034_s16, %s2731_s16   ;;  %s4025_s17 = sphi %s5032_s17, %s5296_s17   ;;  %s4021_s15 = sphi %s5293_s15, %s5295_s15   ;;  %s4017_s11 = sphi %s5292_s11, %s5294_s11  }
 0xc37   : >> { %2738 = vst [vmem:[%s4017_s11] sm:$0xff] %v2737_v54  ;;  %2740 = vst [vmem:[%s4017_s11 + $0x8] sm:$0xff] %v2739_v7  ;;  %v2743_v57 = vld [vmem:[%s4021_s15 + $0x18] sm:$0xff]  ;;  %v2745_v58 = vld [vmem:[%s4021_s15 + $0x20] sm:$0xff]  ;;  %p2802_p6 = scmp.ge.s32.totalorder %s2801_s23, %s5023_s10  ;;  %p2730_p7 = scmp.ge.s32.totalorder %s2731_s16, %s5023_s10 }
 0xc38   : >> { %2742 = vst [vmem:[%s4017_s11 + $0x10] sm:$0xff] %v2741_v56  ;;  %v2747_v60 = vld [vmem:[%s4021_s15 + $0x28] sm:$0xff]  ;;  %2744 = vst [vmem:[%s4017_s11 + $0x18] sm:$0xff] %v2743_v57  ;;  %v2749_v62 = vld [vmem:[%s4021_s15 + $0x30] sm:$0xff] }
 0xc39   : >> { %2746 = vst [vmem:[%s4017_s11 + $0x20] sm:$0xff] %v2745_v58  ;;  %2748 = vst [vmem:[%s4017_s11 + $0x28] sm:$0xff] %v2747_v60  ;;  %v2751_v63 = vld [vmem:[%s4021_s15 + $0x38] sm:$0xff]  ;;  %v2753_v1 = vld [vmem:[%s4021_s15 + $0x40] sm:$0xff]  ;;  %s5314_s23 = smov (%p2802_p6, %s2801_s23), 0 }
 0xc3a   : >> { %2750 = vst [vmem:[%s4017_s11 + $0x30] sm:$0xff] %v2749_v62  ;;  %2752 = vst [vmem:[%s4017_s11 + $0x38] sm:$0xff] %v2751_v63  ;;  %v2755_v0 = vld [vmem:[%s4021_s15 + $0x48] sm:$0xff]  ;;  %v2757_v2 = vld [vmem:[%s4021_s15 + $0x50] sm:$0xff]  ;;  %s3432_s8 = sshll.u32 %s5314_s23, 8  ;;  %s5296_s17 = smov %s5314_s23 }
 0xc3b   : >> { %2754 = vst [vmem:[%s4017_s11 + $0x40] sm:$0xff] %v2753_v1  ;;  %v2759_v4 = vld [vmem:[%s4021_s15 + $0x58] sm:$0xff]  ;;  %2756 = vst [vmem:[%s4017_s11 + $0x48] sm:$0xff] %v2755_v0  ;;  %v2761_v3 = vld [vmem:[%s4021_s15 + $0x60] sm:$0xff]  ;;  %s5090_s9 = scalar_lea.vmem %s4742_s18, %s3432_s8 [#allocation3]   ;;  %s2807_s7 = scalar_lea.vmem %s5017_s30, %s3432_s8  }
 0xc3c   : >> { %2758 = vst [vmem:[%s4017_s11 + $0x50] sm:$0xff] %v2757_v2  ;;  %2760 = vst [vmem:[%s4017_s11 + $0x58] sm:$0xff] %v2759_v4  ;;  %v2763_v8 = vld [vmem:[%s4021_s15 + $0x68] sm:$0xff]  ;;  %v2765_v9 = vld [vmem:[%s4021_s15 + $0x70] sm:$0xff] }
 0xc3d   : >> { %2762 = vst [vmem:[%s4017_s11 + $0x60] sm:$0xff] %v2761_v3  ;;  %2764 = vst [vmem:[%s4017_s11 + $0x68] sm:$0xff] %v2763_v8  ;;  %v2767_v11 = vld [vmem:[%s4021_s15 + $0x78] sm:$0xff]  ;;  %v2769_v13 = vld [vmem:[%s4021_s15 + $0x80] sm:$0xff] }
 0xc3e   : >> { %2766 = vst [vmem:[%s4017_s11 + $0x70] sm:$0xff] %v2765_v9  ;;  %v2771_v17 = vld [vmem:[%s4021_s15 + $0x88] sm:$0xff]  ;;  %2768 = vst [vmem:[%s4017_s11 + $0x78] sm:$0xff] %v2767_v11  ;;  %v2773_v14 = vld [vmem:[%s4021_s15 + $0x90] sm:$0xff] }
 0xc3f   : >> { %2770 = vst [vmem:[%s4017_s11 + $0x80] sm:$0xff] %v2769_v13  ;;  %2772 = vst [vmem:[%s4017_s11 + $0x88] sm:$0xff] %v2771_v17  ;;  %v2775_v15 = vld [vmem:[%s4021_s15 + $0x98] sm:$0xff]  ;;  %v2777_v47 = vld [vmem:[%s4021_s15 + $0xa0] sm:$0xff] }
 0xc40   : >> { %2774 = vst [vmem:[%s4017_s11 + $0x90] sm:$0xff] %v2773_v14  ;;  %2776 = vst [vmem:[%s4017_s11 + $0x98] sm:$0xff] %v2775_v15  ;;  %v2779_v20 = vld [vmem:[%s4021_s15 + $0xa8] sm:$0xff]  ;;  %v2781_v24 = vld [vmem:[%s4021_s15 + $0xb0] sm:$0xff]  ;;  %2733 = sbr.rel (!%p2730_p7) target bundleno = 3126 (0xc36), region = 288 }
 0xc41   : >> { %2778 = vst [vmem:[%s4017_s11 + $0xa0] sm:$0xff] %v2777_v47  ;;  %v2783_v21 = vld [vmem:[%s4021_s15 + $0xb8] sm:$0xff]  ;;  %2780 = vst [vmem:[%s4017_s11 + $0xa8] sm:$0xff] %v2779_v20  ;;  %v2785_v26 = vld [vmem:[%s4021_s15 + $0xc0] sm:$0xff] }
 0xc42   : >> { %2782 = vst [vmem:[%s4017_s11 + $0xb0] sm:$0xff] %v2781_v24  ;;  %2784 = vst [vmem:[%s4017_s11 + $0xb8] sm:$0xff] %v2783_v21  ;;  %v2787_v48 = vld [vmem:[%s4021_s15 + $0xc8] sm:$0xff]  ;;  %v2789_v6 = vld [vmem:[%s4021_s15 + $0xd0] sm:$0xff] }
 0xc43   : >> { %2786 = vst [vmem:[%s4017_s11 + $0xc0] sm:$0xff] %v2785_v26  ;;  %2788 = vst [vmem:[%s4017_s11 + $0xc8] sm:$0xff] %v2787_v48  ;;  %v2791_v55 = vld [vmem:[%s4021_s15 + $0xd8] sm:$0xff]  ;;  %v2793_v33 = vld [vmem:[%s4021_s15 + $0xe0] sm:$0xff] }
 0xc44   : >> { %2790 = vst [vmem:[%s4017_s11 + $0xd0] sm:$0xff] %v2789_v6  ;;  %v2795_v41 = vld [vmem:[%s4021_s15 + $0xe8] sm:$0xff]  ;;  %2792 = vst [vmem:[%s4017_s11 + $0xd8] sm:$0xff] %v2791_v55  ;;  %v2797_v19 = vld [vmem:[%s4021_s15 + $0xf0] sm:$0xff] }
 0xc45   : >> { %2794 = vst [vmem:[%s4017_s11 + $0xe0] sm:$0xff] %v2793_v33  ;;  %2796 = vst [vmem:[%s4017_s11 + $0xe8] sm:$0xff] %v2795_v41  ;;  %v2799_v50 = vld [vmem:[%s4021_s15 + $0xf8] sm:$0xff]  ;;  %s5295_s15 = smov %s5090_s9 }
 0xc46   : >> { %2798 = vst [vmem:[%s4017_s11 + $0xf0] sm:$0xff] %v2797_v19  ;;  %2800 = vst [vmem:[%s4017_s11 + $0xf8] sm:$0xff] %v2799_v50  ;;  %s5294_s11 = smov %s2807_s7 }
 0xc47 PF: > { %s5131_s14 = sand.u32 31, %s5312_s20   ;;  %s3460_s12 = sshll.u32 %s5023_s10, 8 }
 0xc48   : > { %s2812_s24 = scalar_lea.vmem %s4742_s18, %s3460_s12 [#allocation3]   ;;  %s2814_s28 = scalar_lea.vmem %s5017_s30, %s3460_s12  }
 0xc49   : > { %p3437_p8 = scmp.le.s32.totalorder %s5131_s14, 0 }
 0xc4a   : > { %s4031_s29 = smov (!%p3437_p8), %s2814_s28   ;;  %s4035_s6 = smov (!%p3437_p8), %s2812_s24  }
 0xc4b   : > { %3247 = sbr.rel (%p3437_p8) target bundleno = 3164 (0xc5c), region = 293  ;;  %s4039_s8 = smov (!%p3437_p8), 0  }
 0xc4c   : > { %s4043_s23 = smov (!%p3437_p8), 0  }
 0xc52 LB: >> { %v2824_v18 = vld [vmem:[%s4037_s6] sm:$0xff]  ;;  %s2826_s20 = sadd.s32 1, %s4041_s8  ;;  %s2818_s23 = sadd.s32 1, %s4045_s23   ;;  %s4045_s23 = sphi %s4043_s23, %s2818_s23   ;;  %s4041_s8 = sphi %s4039_s8, %s4040_s8   ;;  %s4037_s6 = sphi %s4035_s6, %s2831_s6   ;;  %s4033_s29 = sphi %s4031_s29, %s2832_s29  }
 0xc53   : >> { %2825 = vst [vmem:[%s4033_s29] sm:$0xff] %v2824_v18  ;;  %p2827_p9 = scmp.ge.s32.totalorder %s2826_s20, %s5131_s14  ;;  %p2817_p10 = scmp.ge.s32.totalorder %s2818_s23, %s5131_s14 }
 0xc55   : >> { %s5316_s20 = smov (%p2827_p9, %s2826_s20), 0  ;;  %2820 = sbr.rel (!%p2817_p10) target bundleno = 3154 (0xc52), region = 299 }
 0xc56   : >> { %s3438_s18 = sshll.u32 %s5316_s20, 3  ;;  %s4040_s8 = smov %s5316_s20  }
 0xc57   : >> { %s2831_s6 = scalar_lea.vmem %s2812_s24, %s3438_s18 [#allocation3]   ;;  %s2832_s29 = scalar_lea.vmem %s2814_s28, %s3438_s18  }
 0xc5c PF: > { %2838 = sbr.rel (!%p4136_p4) target bundleno = 3227 (0xc9b), region = 140  ;;  %s2840_s30 = ssub.s32 (%p4136_p4), 38, %s4141_s27 }
 0xc5d   : > { %s3462_s10 = sshll.u32 (%p4136_p4), %s4124_s21, 8  ;;  %p2841_p11 = scmp.lt.s32.totalorder (%p4136_p4), %s2840_s30, 32 }
 0xc5e   : > { %s5146_s17 = scalar_lea.vmem (%p4136_p4), %s5283_s5, %s3462_s10  }
 0xc63   : > { %s5318_s30 = smov (!%p2841_p11, %s2840_s30), 32 }
 0xc64   : > { %s3441_s16 = sshll.u32 %s5318_s30, 7 }
 0xc65   : > { %p3444_p12 = scmp.eq.s32.totalorder %s3441_s16, 0 }
 0xc66   : > { %s5152_s9 = sshrl.u32 (!%p3444_p12), %s5318_s30, 5 }
 0xc67   : > { %2849 = sbr.rel (%p3444_p12) target bundleno = 3227 (0xc9b), region = 144  ;;  %p3445_p4 = scmp.le.s32.totalorder (!%p3444_p12), %s5152_s9, 0 }
 0xc6e   : > { %3261 = sbr.rel (%p3445_p4) target bundleno = 3206 (0xc86), region = 304  ;;  %s5297_s21 = smov (!%p3445_p4), %s5146_s17 }
 0xc6f   : > { %s5298_s26 = smov (!%p3445_p4), %s4815_s13  ;;  %s5161_s27 = smov (!%p3445_p4), 0  }
 0xc70   : > { %s5163_s7 = smov (!%p3445_p4), 0  }
 0xc75 LB: >> { %v2973_v42 = vld [vmem:[%s4053_s26] sm:$0xff]  ;;  %v2975_v43 = vld [vmem:[%s4053_s26 + $0x8] sm:$0xff]  ;;  %v2977_v30 = vld [vmem:[%s4053_s26 + $0x10] sm:$0xff]  ;;  %s3037_s14 = sadd.s32 1, %s4057_s27  ;;  %s2967_s7 = sadd.s32 1, %s4061_s7   ;;  %s4061_s7 = sphi %s5163_s7, %s2967_s7   ;;  %s4057_s27 = sphi %s5161_s27, %s5301_s27   ;;  %s4053_s26 = sphi %s5298_s26, %s5300_s26   ;;  %s4049_s21 = sphi %s5297_s21, %s5299_s21  }
 0xc76   : >> { %2974 = vst [vmem:[%s4049_s21] sm:$0xff] %v2973_v42  ;;  %2976 = vst [vmem:[%s4049_s21 + $0x8] sm:$0xff] %v2975_v43  ;;  %v2979_v31 = vld [vmem:[%s4053_s26 + $0x18] sm:$0xff]  ;;  %v2981_v61 = vld [vmem:[%s4053_s26 + $0x20] sm:$0xff]  ;;  %p3038_p13 = scmp.ge.s32.totalorder %s3037_s14, %s5152_s9  ;;  %p2966_p0 = scmp.ge.s32.totalorder %s2967_s7, %s5152_s9 }
 0xc77   : >> { %2978 = vst [vmem:[%s4049_s21 + $0x10] sm:$0xff] %v2977_v30  ;;  %v2983_v28 = vld [vmem:[%s4053_s26 + $0x28] sm:$0xff]  ;;  %2980 = vst [vmem:[%s4049_s21 + $0x18] sm:$0xff] %v2979_v31  ;;  %v2985_v32 = vld [vmem:[%s4053_s26 + $0x30] sm:$0xff] }
 0xc78   : >> { %2982 = vst [vmem:[%s4049_s21 + $0x20] sm:$0xff] %v2981_v61  ;;  %2984 = vst [vmem:[%s4049_s21 + $0x28] sm:$0xff] %v2983_v28  ;;  %v2987_v34 = vld [vmem:[%s4053_s26 + $0x38] sm:$0xff]  ;;  %v2989_v35 = vld [vmem:[%s4053_s26 + $0x40] sm:$0xff]  ;;  %s5320_s14 = smov (%p3038_p13, %s3037_s14), 0 }
 0xc79   : >> { %2986 = vst [vmem:[%s4049_s21 + $0x30] sm:$0xff] %v2985_v32  ;;  %2988 = vst [vmem:[%s4049_s21 + $0x38] sm:$0xff] %v2987_v34  ;;  %v2991_v23 = vld [vmem:[%s4053_s26 + $0x48] sm:$0xff]  ;;  %v2993_v12 = vld [vmem:[%s4053_s26 + $0x50] sm:$0xff]  ;;  %s3446_s12 = sshll.u32 %s5320_s14, 8  ;;  %s5301_s27 = smov %s5320_s14 }
 0xc7a   : >> { %2990 = vst [vmem:[%s4049_s21 + $0x40] sm:$0xff] %v2989_v35  ;;  %v2995_v25 = vld [vmem:[%s4053_s26 + $0x58] sm:$0xff]  ;;  %2992 = vst [vmem:[%s4049_s21 + $0x48] sm:$0xff] %v2991_v23  ;;  %v2997_v10 = vld [vmem:[%s4053_s26 + $0x60] sm:$0xff]  ;;  %s5219_s24 = scalar_lea.vmem %s4815_s13, %s3446_s12 [#allocation4]   ;;  %s3043_s28 = scalar_lea.vmem %s5146_s17, %s3446_s12  }
 0xc7b   : >> { %2994 = vst [vmem:[%s4049_s21 + $0x50] sm:$0xff] %v2993_v12  ;;  %2996 = vst [vmem:[%s4049_s21 + $0x58] sm:$0xff] %v2995_v25  ;;  %v2999_v29 = vld [vmem:[%s4053_s26 + $0x68] sm:$0xff]  ;;  %v3001_v36 = vld [vmem:[%s4053_s26 + $0x70] sm:$0xff] }
 0xc7c   : >> { %2998 = vst [vmem:[%s4049_s21 + $0x60] sm:$0xff] %v2997_v10  ;;  %3000 = vst [vmem:[%s4049_s21 + $0x68] sm:$0xff] %v2999_v29  ;;  %v3003_v37 = vld [vmem:[%s4053_s26 + $0x78] sm:$0xff]  ;;  %v3005_v16 = vld [vmem:[%s4053_s26 + $0x80] sm:$0xff] }
 0xc7d   : >> { %3002 = vst [vmem:[%s4049_s21 + $0x70] sm:$0xff] %v3001_v36  ;;  %v3007_v27 = vld [vmem:[%s4053_s26 + $0x88] sm:$0xff]  ;;  %3004 = vst [vmem:[%s4049_s21 + $0x78] sm:$0xff] %v3003_v37  ;;  %v3009_v38 = vld [vmem:[%s4053_s26 + $0x90] sm:$0xff] }
 0xc7e   : >> { %3006 = vst [vmem:[%s4049_s21 + $0x80] sm:$0xff] %v3005_v16  ;;  %3008 = vst [vmem:[%s4049_s21 + $0x88] sm:$0xff] %v3007_v27  ;;  %v3011_v39 = vld [vmem:[%s4053_s26 + $0x98] sm:$0xff]  ;;  %v3013_v40 = vld [vmem:[%s4053_s26 + $0xa0] sm:$0xff] }
 0xc7f   : >> { %3010 = vst [vmem:[%s4049_s21 + $0x90] sm:$0xff] %v3009_v38  ;;  %3012 = vst [vmem:[%s4049_s21 + $0x98] sm:$0xff] %v3011_v39  ;;  %v3015_v44 = vld [vmem:[%s4053_s26 + $0xa8] sm:$0xff]  ;;  %v3017_v46 = vld [vmem:[%s4053_s26 + $0xb0] sm:$0xff]  ;;  %2969 = sbr.rel (!%p2966_p0) target bundleno = 3189 (0xc75), region = 310 }
 0xc80   : >> { %3014 = vst [vmem:[%s4049_s21 + $0xa0] sm:$0xff] %v3013_v40  ;;  %v3019_v45 = vld [vmem:[%s4053_s26 + $0xb8] sm:$0xff]  ;;  %3016 = vst [vmem:[%s4049_s21 + $0xa8] sm:$0xff] %v3015_v44  ;;  %v3021_v49 = vld [vmem:[%s4053_s26 + $0xc0] sm:$0xff] }
 0xc81   : >> { %3018 = vst [vmem:[%s4049_s21 + $0xb0] sm:$0xff] %v3017_v46  ;;  %3020 = vst [vmem:[%s4049_s21 + $0xb8] sm:$0xff] %v3019_v45  ;;  %v3023_v5 = vld [vmem:[%s4053_s26 + $0xc8] sm:$0xff]  ;;  %v3025_v51 = vld [vmem:[%s4053_s26 + $0xd0] sm:$0xff] }
 0xc82   : >> { %3022 = vst [vmem:[%s4049_s21 + $0xc0] sm:$0xff] %v3021_v49  ;;  %3024 = vst [vmem:[%s4049_s21 + $0xc8] sm:$0xff] %v3023_v5  ;;  %v3027_v52 = vld [vmem:[%s4053_s26 + $0xd8] sm:$0xff]  ;;  %v3029_v53 = vld [vmem:[%s4053_s26 + $0xe0] sm:$0xff] }
 0xc83   : >> { %3026 = vst [vmem:[%s4049_s21 + $0xd0] sm:$0xff] %v3025_v51  ;;  %v3031_v59 = vld [vmem:[%s4053_s26 + $0xe8] sm:$0xff]  ;;  %3028 = vst [vmem:[%s4049_s21 + $0xd8] sm:$0xff] %v3027_v52  ;;  %v3033_v22 = vld [vmem:[%s4053_s26 + $0xf0] sm:$0xff] }
 0xc84   : >> { %3030 = vst [vmem:[%s4049_s21 + $0xe0] sm:$0xff] %v3029_v53  ;;  %3032 = vst [vmem:[%s4049_s21 + $0xe8] sm:$0xff] %v3031_v59  ;;  %v3035_v54 = vld [vmem:[%s4053_s26 + $0xf8] sm:$0xff]  ;;  %s5300_s26 = smov %s5219_s24 }
 0xc85   : >> { %3034 = vst [vmem:[%s4049_s21 + $0xf0] sm:$0xff] %v3033_v22  ;;  %3036 = vst [vmem:[%s4049_s21 + $0xf8] sm:$0xff] %v3035_v54  ;;  %s5299_s21 = smov %s3043_s28 }
 0xc86 PF: > { %s5260_s29 = sand.u32 31, %s5318_s30   ;;  %s3463_s6 = sshll.u32 %s5152_s9, 8 }
 0xc87   : > { %s3048_s8 = scalar_lea.vmem %s4815_s13, %s3463_s6 [#allocation4]   ;;  %s3050_s23 = scalar_lea.vmem %s5146_s17, %s3463_s6  }
 0xc88   : > { %p3451_p1 = scmp.le.s32.totalorder %s5260_s29, 0 }
 0xc89   : > { %s4063_s20 = smov (!%p3451_p1), %s3050_s23   ;;  %s4067_s18 = smov (!%p3451_p1), %s3048_s8  }
 0xc8a   : > { %3275 = sbr.rel (%p3451_p1) target bundleno = 3227 (0xc9b), region = 315  ;;  %s4071_s10 = smov (!%p3451_p1), 0  }
 0xc8b   : > { %s4075_s11 = smov (!%p3451_p1), 0  }
 0xc91 LB: >> { %v3060_v7 = vld [vmem:[%s4069_s18] sm:$0xff]  ;;  %s3062_s30 = sadd.s32 1, %s4073_s10  ;;  %s3054_s11 = sadd.s32 1, %s4077_s11   ;;  %s4077_s11 = sphi %s4075_s11, %s3054_s11   ;;  %s4073_s10 = sphi %s4071_s10, %s4072_s10   ;;  %s4069_s18 = sphi %s4067_s18, %s3067_s18   ;;  %s4065_s20 = sphi %s4063_s20, %s3068_s20  }
 0xc92   : >> { %3061 = vst [vmem:[%s4065_s20] sm:$0xff] %v3060_v7  ;;  %p3063_p2 = scmp.ge.s32.totalorder %s3062_s30, %s5260_s29  ;;  %p3053_p3 = scmp.ge.s32.totalorder %s3054_s11, %s5260_s29 }
 0xc94   : >> { %s5322_s30 = smov (%p3063_p2, %s3062_s30), 0  ;;  %3056 = sbr.rel (!%p3053_p3) target bundleno = 3217 (0xc91), region = 321 }
 0xc95   : >> { %s3452_s13 = sshll.u32 %s5322_s30, 3  ;;  %s4072_s10 = smov %s5322_s30  }
 0xc96   : >> { %s3067_s18 = scalar_lea.vmem %s3048_s8, %s3452_s13 [#allocation4]   ;;  %s3068_s20 = scalar_lea.vmem %s3050_s23, %s3452_s13  }
 0xc9b PF: > { %p13_p5 = scmp.ge.s32.totalorder %s4126_s22, 4   ;;  %s5302_s18 = smov %s3977_s19 }
 0xc9c   : > { %s5303_s19 = smov %s4134_s25  ;;  %s5304_s20 = smov %s4126_s22 }
 0xc9d   :  { %15 = sbr.rel (!%p13_p5) target bundleno = 2 (0x2), region = 332 }

</bundles_post_ra>
